<compile_context>
chip_gen: v5e
topology: v5e:2x2
jax: 0.10.0
libtpu: 0.0.40
codegen_flags: <defaults>
</compile_context>

<pallas_src>
import functools

import jax
import jax.numpy as jnp
from jax import lax
from jax.experimental import pallas as pl
from jax.experimental.pallas import tpu as pltpu

HIDDEN = 32        # hidden channels of the stand-in denoiser
KIN = 3            # conv1 input channels: [real, imag, noise-level map]
TAPS1 = 9 * KIN    # 27 conv1 taps, ordered (i,j)-major then input channel
TAPS2 = 9          # conv2 taps per hidden channel


# ----------------------------- Pallas kernel -------------------------------

def _denoiser_kernel(sigma_ref, w1_ref, b1_ref, w2r_ref, w2i_ref, b2_ref,
                     x_ref, out_ref, xpad_ref, hpad_ref, *,
                     H, W, scale, out_scale):
    """Fully fused denoiser for ONE image (channels-first in VMEM).

    SMEM:  sigma (1,), w1 (HIDDEN*27,) [k*27 + tap*KIN + c], b1 (HIDDEN,),
           w2r/w2i (HIDDEN*9,) [k*9 + tap], b2 (2,)
    VMEM:  x (1,2,H,W) input block, out (1,H,2W) output block,
           xpad (KIN,H+2,W+2) / hpad (HIDDEN,H+2,W+2) scratch.
    """
    f32 = jnp.float32
    sig = sigma_ref[0]

    # ---- halo-only zeroing ---------------------------------------------------
    # The interiors are fully overwritten every grid step, so only the 1-pixel
    # borders need zeroing (thin strips -> negligible vst traffic vs a full
    # (HIDDEN,H+2,W+2) memset per image).
    xpad_ref[:, 0:1, :] = jnp.zeros((KIN, 1, W + 2), f32)
    xpad_ref[:, H + 1:H + 2, :] = jnp.zeros((KIN, 1, W + 2), f32)
    xpad_ref[:, :, 0:1] = jnp.zeros((KIN, H + 2, 1), f32)
    xpad_ref[:, :, W + 1:W + 2] = jnp.zeros((KIN, H + 2, 1), f32)
    hpad_ref[:, 0:1, :] = jnp.zeros((HIDDEN, 1, W + 2), f32)
    hpad_ref[:, H + 1:H + 2, :] = jnp.zeros((HIDDEN, 1, W + 2), f32)
    hpad_ref[:, :, 0:1] = jnp.zeros((HIDDEN, H + 2, 1), f32)
    hpad_ref[:, :, W + 1:W + 2] = jnp.zeros((HIDDEN, H + 2, 1), f32)

    # ---- stage 0: scaled, sigma-conditioned, zero-padded input --------------
    x2 = x_ref[0]                       # (2, H, W)
    x_sr = x2[0] * scale                # scaled real (residual branch below)
    x_si = x2[1] * scale                # scaled imag
    xpad_ref[0, 1:H + 1, 1:W + 1] = x_sr
    xpad_ref[1, 1:H + 1, 1:W + 1] = x_si
    xpad_ref[2, 1:H + 1, 1:W + 1] = jnp.full((H, W), sig, f32)

    # ---- conv1 taps: 27 shifted slabs, loaded / lane-shifted ONCE ------------
    # Row shift (i) is a cheap sublane-offset read; column shift (j) is an XLU
    # lane shift.  Paying it once here and reusing the slabs for all 32 hidden
    # channels keeps the relayout cost off the MAC critical path.
    taps = []
    for i in range(3):
        for j in range(3):
            for c in range(KIN):
                taps.append(xpad_ref[c, i:i + H, j:j + W])   # (H, W)

    # ---- conv1: 3x3, KIN -> HIDDEN --------------------------------------------
    # Per hidden channel: the (H,W) accumulator stays vreg-resident across all
    # 27 MACs (scalar weights splatted from SMEM), then bias + ReLU, then ONE
    # store directly into the interior of hpad_ref.
    def conv1_body(k, carry):
        base = k * TAPS1
        acc = taps[0] * w1_ref[base]
        for t in range(1, TAPS1):
            acc = acc + taps[t] * w1_ref[base + t]
        hpad_ref[k, 1:H + 1, 1:W + 1] = jnp.maximum(acc + b1_ref[k], 0.0)
        return carry

    lax.fori_loop(0, HIDDEN, conv1_body, 0)

    # ---- conv2: 3x3, HIDDEN -> 2 ----------------------------------------------
    # The two (H,W) output accumulators are loop carries (vreg resident) across
    # all 32*9 = 288 MACs; per-tap weights are SMEM scalars.  N=2 is hopeless
    # for the MXU, so this stays on the VPU.
    def conv2_body(k, carry):
        acc_r, acc_i = carry
        kb = k * TAPS2
        for i in range(3):
            for j in range(3):
                ht = hpad_ref[k, i:i + H, j:j + W]           # (H, W)
                t = i * 3 + j
                acc_r = acc_r + ht * w2r_ref[kb + t]
                acc_i = acc_i + ht * w2i_ref[kb + t]
        return acc_r, acc_i

    acc_r, acc_i = lax.fori_loop(
        0, HIDDEN, conv2_body,
        (jnp.zeros((H, W), f32), jnp.zeros((H, W), f32)))

    # ---- bias + residual (on the *scaled* input) + inverse scale --------------
    out_r = (acc_r + b2_ref[0] + x_sr) * out_scale
    out_i = (acc_i + b2_ref[1] + x_si) * out_scale

    # Lane-packed [real | imag] output slab, two direct stores (no concat copy).
    out_ref[0, 0:H, 0:W] = out_r
    out_ref[0, 0:H, W:2 * W] = out_i


# ------------------------------- JAX glue ----------------------------------

def init_params(key):
    k1, k2, k3, k4 = jax.random.split(key, 4)
    w1 = jax.random.normal(k1, (TAPS1, HIDDEN), jnp.float32) * 0.05
    b1 = jax.random.normal(k2, (HIDDEN,), jnp.float32) * 0.01
    w2 = jax.random.normal(k3, (9 * HIDDEN, 2), jnp.float32) * 0.05
    b2 = jax.random.normal(k4, (2,), jnp.float32) * 0.01
    return w1, b1, w2, b2


def _vmem_limit_bytes():
    # v5e/v6e: 128 MiB physical VMEM -> allow big whole-image blocks (~96 MiB).
    # v7x: 64 MiB per TensorCore -> stays at <= 48 MiB.
    try:
        cap = pltpu.get_tpu_info().vmem_capacity_bytes
        return int(min(cap * 3 // 4, 96 * 1024 * 1024))
    except Exception:
        return 32 * 1024 * 1024


@functools.partial(jax.jit, static_argnames=("norm",))
def denoiser_forward(x_complex, sigma, params, norm=True):
    """Mirrors Denoiser.forward: (1,B,H,W) complex -> (1,B,H,W) complex."""
    w1, b1, w2, b2 = params

    x = jnp.squeeze(x_complex, axis=0)                        # (B,H,W) complex
    # view_as_real + permute(0,3,1,2)  ->  NCHW (B, 2, H, W), [real, imag]
    x_nchw = jnp.stack([jnp.real(x), jnp.imag(x)], axis=1).astype(jnp.float32)
    B, _, H, W = x_nchw.shape

    # SMEM-friendly flat weight layouts (tiny, one-off relayout under jit).
    w1_s = w1.T.reshape(-1)                                   # (HIDDEN*27,)  k*27 + t
    b1_s = b1.astype(jnp.float32)                             # (HIDDEN,)
    w2_t = w2.reshape(9, HIDDEN, 2)
    w2r_s = w2_t[:, :, 0].T.reshape(-1)                       # (HIDDEN*9,)   k*9 + t
    w2i_s = w2_t[:, :, 1].T.reshape(-1)                       # (HIDDEN*9,)
    b2_s = b2.astype(jnp.float32)                             # (2,)
    sigma_arr = jnp.full((1,), sigma, jnp.float32)

    scale = 10000.0 if norm else 1.0
    out_scale = 0.0001 if norm else 1.0

    kernel = functools.partial(_denoiser_kernel, H=H, W=W,
                               scale=scale, out_scale=out_scale)

    smem = pl.BlockSpec(memory_space=pltpu.MemorySpace.SMEM)
    out2 = pl.pallas_call(
        kernel,
        out_shape=jax.ShapeDtypeStruct((B, H, 2 * W), jnp.float32),
        grid=(B,),
        in_specs=[
            smem,                                              # sigma
            smem,                                              # w1 (flat)
            smem,                                              # b1
            smem,                                              # w2 real (flat)
            smem,                                              # w2 imag (flat)
            smem,                                              # b2
            pl.BlockSpec((1, 2, H, W), lambda b: (b, 0, 0, 0)),  # image
        ],
        out_specs=pl.BlockSpec((1, H, 2 * W), lambda b: (b, 0, 0)),
        scratch_shapes=[
            pltpu.VMEM((KIN, H + 2, W + 2), jnp.float32),      # padded input
            pltpu.VMEM((HIDDEN, H + 2, W + 2), jnp.float32),   # padded hidden
        ],
        compiler_params=pltpu.CompilerParams(
            dimension_semantics=("parallel",),     # images across TCs (v7x)
            vmem_limit_bytes=_vmem_limit_bytes(),
        ),
    )(sigma_arr, w1_s, b1_s, w2r_s, w2i_s, b2_s, x_nchw)

    # Split the lane-packed [real | imag] slab and rebuild the complex output.
    out_c = jax.lax.complex(out2[:, :, :W], out2[:, :, W:])   # (B, H, W)
    return out_c[None]                                        # unsqueeze(0)


# ----------------------- pure-JAX reference (no Pallas) ---------------------

def im2col3x3(x):
    """x: (B,H,W,C) -> (B*H*W, 9*C) patches for a 3x3 'SAME' conv."""
    B, H, W, C = x.shape
    xp = jnp.pad(x, ((0, 0), (1, 1), (1, 1), (0, 0)))
    patches = [xp[:, i:i + H, j:j + W, :] for i in range(3) for j in range(3)]
    return jnp.concatenate(patches, axis=-1).reshape(B * H * W, 9 * C)


def denoiser_forward_ref(x_complex, sigma, params, norm=True):
    w1, b1, w2, b2 = params
    x = jnp.squeeze(x_complex, axis=0)
    x = jnp.stack([jnp.real(x), jnp.imag(x)], axis=-1).astype(jnp.float32)
    if norm:
        x = x * 10000.0
    B, H, W, _ = x.shape
    noise_map = jnp.full((B, H, W, 1), jnp.float32(sigma))
    x_in = jnp.concatenate([x, noise_map], axis=-1)
    h = jnp.maximum(im2col3x3(x_in) @ w1 + b1, 0.0).reshape(B, H, W, HIDDEN)
    out = (im2col3x3(h) @ w2 + b2 + x.reshape(B * H * W, 2)).reshape(B, H, W, 2)
    if norm:
        out = out * 0.0001
    return jax.lax.complex(out[..., 0], out[..., 1])[None]


# --------------------------------- main -------------------------------------

if __name__ == "__main__":
    key = jax.random.PRNGKey(0)
    kp, kr, ki = jax.random.split(key, 3)

    B, H, W = 2, 16, 16
    params = init_params(kp)

    xr = jax.random.normal(kr, (1, B, H, W), jnp.float32)
    xi = jax.random.normal(ki, (1, B, H, W), jnp.float32)
    x = jax.lax.complex(xr, xi) * 1e-4          # small-magnitude complex input
    sigma = 0.05

    out = jax.block_until_ready(denoiser_forward(x, sigma, params, norm=True))
    ref = jax.block_until_ready(denoiser_forward_ref(x, sigma, params, norm=True))

    assert out.shape == (1, B, H, W) and out.dtype == jnp.complex64
    assert jnp.allclose(out, ref, rtol=1e-4, atol=1e-7), "mismatch vs JAX reference"

    print("KERNEL_OK")
</pallas_src>

<mosaic_0001>
module attributes {stable_mosaic.version = 11 : i64} {
  func.func @_denoiser_kernel(%arg0: i32, %arg1: memref<1xf32, #tpu.memory_space<smem>>, %arg2: memref<864xf32, #tpu.memory_space<smem>>, %arg3: memref<32xf32, #tpu.memory_space<smem>>, %arg4: memref<288xf32, #tpu.memory_space<smem>>, %arg5: memref<288xf32, #tpu.memory_space<smem>>, %arg6: memref<2xf32, #tpu.memory_space<smem>>, %arg7: memref<1x2x16x16xf32, #tpu.memory_space<vmem>>, %arg8: memref<1x16x32xf32, #tpu.memory_space<vmem>>, %arg9: memref<3x18x18xf32, #tpu.memory_space<vmem>>, %arg10: memref<32x18x18xf32, #tpu.memory_space<vmem>>) attributes {dimension_semantics = [#tpu.dimension_semantics<parallel>], iteration_bounds = array<i64: 2>, scalar_prefetch = 0 : i64, scratch_operands = 2 : i64, tpu.core_type = #tpu.core_type<tc>, window_params = [{transform_indices = @transform_0, window_bounds = array<i64: 1>}, {transform_indices = @transform_1, window_bounds = array<i64: 864>}, {transform_indices = @transform_2, window_bounds = array<i64: 32>}, {transform_indices = @transform_3, window_bounds = array<i64: 288>}, {transform_indices = @transform_4, window_bounds = array<i64: 288>}, {transform_indices = @transform_5, window_bounds = array<i64: 2>}, {transform_indices = @transform_6, window_bounds = array<i64: 1, 2, 16, 16>}, {transform_indices = @transform_7, window_bounds = array<i64: 1, 16, 32>}]} {
    %c0 = arith.constant 0 : index
    %0 = memref.load %arg1[%c0] : memref<1xf32, #tpu.memory_space<smem>>
    %cst = arith.constant 0.000000e+00 : f32
    %1 = vector.broadcast %cst : f32 to vector<3x1x18xf32>
    %c0_0 = arith.constant 0 : index
    %c0_1 = arith.constant 0 : index
    %c0_2 = arith.constant 0 : index
    %2 = vector.load %arg9[%c0_0, %c0_1, %c0_2] : memref<3x18x18xf32, #tpu.memory_space<vmem>>, vector<3x1x18xf32>
    tpu.vector_store %arg9[%c0_0, %c0_1, %c0_2], %1 {strides = array<i32>} : memref<3x18x18xf32, #tpu.memory_space<vmem>>, vector<3x1x18xf32>,
    %cst_3 = arith.constant 0.000000e+00 : f32
    %3 = vector.broadcast %cst_3 : f32 to vector<3x1x18xf32>
    %c0_4 = arith.constant 0 : index
    %c17 = arith.constant 17 : index
    %c0_5 = arith.constant 0 : index
    %4 = vector.load %arg9[%c0_4, %c17, %c0_5] : memref<3x18x18xf32, #tpu.memory_space<vmem>>, vector<3x1x18xf32>
    tpu.vector_store %arg9[%c0_4, %c17, %c0_5], %3 {strides = array<i32>} : memref<3x18x18xf32, #tpu.memory_space<vmem>>, vector<3x1x18xf32>,
    %cst_6 = arith.constant 0.000000e+00 : f32
    %5 = vector.broadcast %cst_6 : f32 to vector<3x18x1xf32>
    %c0_7 = arith.constant 0 : index
    %c0_8 = arith.constant 0 : index
    %c0_9 = arith.constant 0 : index
    %6 = vector.load %arg9[%c0_7, %c0_8, %c0_9] : memref<3x18x18xf32, #tpu.memory_space<vmem>>, vector<3x18x1xf32>
    tpu.vector_store %arg9[%c0_7, %c0_8, %c0_9], %5 {strides = array<i32>} : memref<3x18x18xf32, #tpu.memory_space<vmem>>, vector<3x18x1xf32>,
    %cst_10 = arith.constant 0.000000e+00 : f32
    %7 = vector.broadcast %cst_10 : f32 to vector<3x18x1xf32>
    %c0_11 = arith.constant 0 : index
    %c0_12 = arith.constant 0 : index
    %c17_13 = arith.constant 17 : index
    %8 = vector.load %arg9[%c0_11, %c0_12, %c17_13] : memref<3x18x18xf32, #tpu.memory_space<vmem>>, vector<3x18x1xf32>
    tpu.vector_store %arg9[%c0_11, %c0_12, %c17_13], %7 {strides = array<i32>} : memref<3x18x18xf32, #tpu.memory_space<vmem>>, vector<3x18x1xf32>,
    %cst_14 = arith.constant 0.000000e+00 : f32
    %9 = vector.broadcast %cst_14 : f32 to vector<32x1x18xf32>
    %c0_15 = arith.constant 0 : index
    %c0_16 = arith.constant 0 : index
    %c0_17 = arith.constant 0 : index
    %10 = vector.load %arg10[%c0_15, %c0_16, %c0_17] : memref<32x18x18xf32, #tpu.memory_space<vmem>>, vector<32x1x18xf32>
    tpu.vector_store %arg10[%c0_15, %c0_16, %c0_17], %9 {strides = array<i32>} : memref<32x18x18xf32, #tpu.memory_space<vmem>>, vector<32x1x18xf32>,
    %cst_18 = arith.constant 0.000000e+00 : f32
    %11 = vector.broadcast %cst_18 : f32 to vector<32x1x18xf32>
    %c0_19 = arith.constant 0 : index
    %c17_20 = arith.constant 17 : index
    %c0_21 = arith.constant 0 : index
    %12 = vector.load %arg10[%c0_19, %c17_20, %c0_21] : memref<32x18x18xf32, #tpu.memory_space<vmem>>, vector<32x1x18xf32>
    tpu.vector_store %arg10[%c0_19, %c17_20, %c0_21], %11 {strides = array<i32>} : memref<32x18x18xf32, #tpu.memory_space<vmem>>, vector<32x1x18xf32>,
    %cst_22 = arith.constant 0.000000e+00 : f32
    %13 = vector.broadcast %cst_22 : f32 to vector<32x18x1xf32>
    %c0_23 = arith.constant 0 : index
    %c0_24 = arith.constant 0 : index
    %c0_25 = arith.constant 0 : index
    %14 = vector.load %arg10[%c0_23, %c0_24, %c0_25] : memref<32x18x18xf32, #tpu.memory_space<vmem>>, vector<32x18x1xf32>
    tpu.vector_store %arg10[%c0_23, %c0_24, %c0_25], %13 {strides = array<i32>} : memref<32x18x18xf32, #tpu.memory_space<vmem>>, vector<32x18x1xf32>,
    %cst_26 = arith.constant 0.000000e+00 : f32
    %15 = vector.broadcast %cst_26 : f32 to vector<32x18x1xf32>
    %c0_27 = arith.constant 0 : index
    %c0_28 = arith.constant 0 : index
    %c17_29 = arith.constant 17 : index
    %16 = vector.load %arg10[%c0_27, %c0_28, %c17_29] : memref<32x18x18xf32, #tpu.memory_space<vmem>>, vector<32x18x1xf32>
    tpu.vector_store %arg10[%c0_27, %c0_28, %c17_29], %15 {strides = array<i32>} : memref<32x18x18xf32, #tpu.memory_space<vmem>>, vector<32x18x1xf32>,
    %c0_30 = arith.constant 0 : index
    %c0_31 = arith.constant 0 : index
    %c0_32 = arith.constant 0 : index
    %c0_33 = arith.constant 0 : index
    %17 = vector.load %arg7[%c0_30, %c0_31, %c0_32, %c0_33] : memref<1x2x16x16xf32, #tpu.memory_space<vmem>>, vector<1x2x16x16xf32>
    %18 = vector.shape_cast %17 : vector<1x2x16x16xf32> to vector<2x16x16xf32>
    %19 = vector.extract_strided_slice %18 {offsets = [0, 0, 0], sizes = [1, 16, 16], strides = [1, 1, 1]} : vector<2x16x16xf32> to vector<1x16x16xf32>
    %20 = vector.shape_cast %19 : vector<1x16x16xf32> to vector<16x16xf32>
    %cst_34 = arith.constant 1.000000e+04 : f32
    %21 = vector.broadcast %cst_34 : f32 to vector<16x16xf32>
    %22 = arith.mulf %20, %21 : vector<16x16xf32>
    %23 = vector.extract_strided_slice %18 {offsets = [1, 0, 0], sizes = [1, 16, 16], strides = [1, 1, 1]} : vector<2x16x16xf32> to vector<1x16x16xf32>
    %24 = vector.shape_cast %23 : vector<1x16x16xf32> to vector<16x16xf32>
    %cst_35 = arith.constant 1.000000e+04 : f32
    %25 = vector.broadcast %cst_35 : f32 to vector<16x16xf32>
    %26 = arith.mulf %24, %25 : vector<16x16xf32>
    %c0_36 = arith.constant 0 : index
    %c1 = arith.constant 1 : index
    %c1_37 = arith.constant 1 : index
    %27 = vector.load %arg9[%c0_36, %c1, %c1_37] : memref<3x18x18xf32, #tpu.memory_space<vmem>>, vector<1x16x16xf32>
    %28 = vector.shape_cast %27 : vector<1x16x16xf32> to vector<16x16xf32>
    %29 = vector.shape_cast %22 : vector<16x16xf32> to vector<1x16x16xf32>
    tpu.vector_store %arg9[%c0_36, %c1, %c1_37], %29 {strides = array<i32>} : memref<3x18x18xf32, #tpu.memory_space<vmem>>, vector<1x16x16xf32>,
    %c1_38 = arith.constant 1 : index
    %c1_39 = arith.constant 1 : index
    %c1_40 = arith.constant 1 : index
    %30 = vector.load %arg9[%c1_38, %c1_39, %c1_40] : memref<3x18x18xf32, #tpu.memory_space<vmem>>, vector<1x16x16xf32>
    %31 = vector.shape_cast %30 : vector<1x16x16xf32> to vector<16x16xf32>
    %32 = vector.shape_cast %26 : vector<16x16xf32> to vector<1x16x16xf32>
    tpu.vector_store %arg9[%c1_38, %c1_39, %c1_40], %32 {strides = array<i32>} : memref<3x18x18xf32, #tpu.memory_space<vmem>>, vector<1x16x16xf32>,
    %33 = vector.broadcast %0 : f32 to vector<16x16xf32>
    %c2 = arith.constant 2 : index
    %c1_41 = arith.constant 1 : index
    %c1_42 = arith.constant 1 : index
    %34 = vector.load %arg9[%c2, %c1_41, %c1_42] : memref<3x18x18xf32, #tpu.memory_space<vmem>>, vector<1x16x16xf32>
    %35 = vector.shape_cast %34 : vector<1x16x16xf32> to vector<16x16xf32>
    %36 = vector.shape_cast %33 : vector<16x16xf32> to vector<1x16x16xf32>
    tpu.vector_store %arg9[%c2, %c1_41, %c1_42], %36 {strides = array<i32>} : memref<3x18x18xf32, #tpu.memory_space<vmem>>, vector<1x16x16xf32>,
    %c0_43 = arith.constant 0 : index
    %c0_44 = arith.constant 0 : index
    %c0_45 = arith.constant 0 : index
    %37 = vector.load %arg9[%c0_43, %c0_44, %c0_45] : memref<3x18x18xf32, #tpu.memory_space<vmem>>, vector<1x16x16xf32>
    %38 = vector.shape_cast %37 : vector<1x16x16xf32> to vector<16x16xf32>
    %c1_46 = arith.constant 1 : index
    %c0_47 = arith.constant 0 : index
    %c0_48 = arith.constant 0 : index
    %39 = vector.load %arg9[%c1_46, %c0_47, %c0_48] : memref<3x18x18xf32, #tpu.memory_space<vmem>>, vector<1x16x16xf32>
    %40 = vector.shape_cast %39 : vector<1x16x16xf32> to vector<16x16xf32>
    %c2_49 = arith.constant 2 : index
    %c0_50 = arith.constant 0 : index
    %c0_51 = arith.constant 0 : index
    %41 = vector.load %arg9[%c2_49, %c0_50, %c0_51] : memref<3x18x18xf32, #tpu.memory_space<vmem>>, vector<1x16x16xf32>
    %42 = vector.shape_cast %41 : vector<1x16x16xf32> to vector<16x16xf32>
    %c0_52 = arith.constant 0 : index
    %c0_53 = arith.constant 0 : index
    %c1_54 = arith.constant 1 : index
    %43 = vector.load %arg9[%c0_52, %c0_53, %c1_54] : memref<3x18x18xf32, #tpu.memory_space<vmem>>, vector<1x16x16xf32>
    %44 = vector.shape_cast %43 : vector<1x16x16xf32> to vector<16x16xf32>
    %c1_55 = arith.constant 1 : index
    %c0_56 = arith.constant 0 : index
    %c1_57 = arith.constant 1 : index
    %45 = vector.load %arg9[%c1_55, %c0_56, %c1_57] : memref<3x18x18xf32, #tpu.memory_space<vmem>>, vector<1x16x16xf32>
    %46 = vector.shape_cast %45 : vector<1x16x16xf32> to vector<16x16xf32>
    %c2_58 = arith.constant 2 : index
    %c0_59 = arith.constant 0 : index
    %c1_60 = arith.constant 1 : index
    %47 = vector.load %arg9[%c2_58, %c0_59, %c1_60] : memref<3x18x18xf32, #tpu.memory_space<vmem>>, vector<1x16x16xf32>
    %48 = vector.shape_cast %47 : vector<1x16x16xf32> to vector<16x16xf32>
    %c0_61 = arith.constant 0 : index
    %c0_62 = arith.constant 0 : index
    %c2_63 = arith.constant 2 : index
    %49 = vector.load %arg9[%c0_61, %c0_62, %c2_63] : memref<3x18x18xf32, #tpu.memory_space<vmem>>, vector<1x16x16xf32>
    %50 = vector.shape_cast %49 : vector<1x16x16xf32> to vector<16x16xf32>
    %c1_64 = arith.constant 1 : index
    %c0_65 = arith.constant 0 : index
    %c2_66 = arith.constant 2 : index
    %51 = vector.load %arg9[%c1_64, %c0_65, %c2_66] : memref<3x18x18xf32, #tpu.memory_space<vmem>>, vector<1x16x16xf32>
    %52 = vector.shape_cast %51 : vector<1x16x16xf32> to vector<16x16xf32>
    %c2_67 = arith.constant 2 : index
    %c0_68 = arith.constant 0 : index
    %c2_69 = arith.constant 2 : index
    %53 = vector.load %arg9[%c2_67, %c0_68, %c2_69] : memref<3x18x18xf32, #tpu.memory_space<vmem>>, vector<1x16x16xf32>
    %54 = vector.shape_cast %53 : vector<1x16x16xf32> to vector<16x16xf32>
    %c0_70 = arith.constant 0 : index
    %c1_71 = arith.constant 1 : index
    %c0_72 = arith.constant 0 : index
    %55 = vector.load %arg9[%c0_70, %c1_71, %c0_72] : memref<3x18x18xf32, #tpu.memory_space<vmem>>, vector<1x16x16xf32>
    %56 = vector.shape_cast %55 : vector<1x16x16xf32> to vector<16x16xf32>
    %c1_73 = arith.constant 1 : index
    %c1_74 = arith.constant 1 : index
    %c0_75 = arith.constant 0 : index
    %57 = vector.load %arg9[%c1_73, %c1_74, %c0_75] : memref<3x18x18xf32, #tpu.memory_space<vmem>>, vector<1x16x16xf32>
    %58 = vector.shape_cast %57 : vector<1x16x16xf32> to vector<16x16xf32>
    %c2_76 = arith.constant 2 : index
    %c1_77 = arith.constant 1 : index
    %c0_78 = arith.constant 0 : index
    %59 = vector.load %arg9[%c2_76, %c1_77, %c0_78] : memref<3x18x18xf32, #tpu.memory_space<vmem>>, vector<1x16x16xf32>
    %60 = vector.shape_cast %59 : vector<1x16x16xf32> to vector<16x16xf32>
    %c0_79 = arith.constant 0 : index
    %c1_80 = arith.constant 1 : index
    %c1_81 = arith.constant 1 : index
    %61 = vector.load %arg9[%c0_79, %c1_80, %c1_81] : memref<3x18x18xf32, #tpu.memory_space<vmem>>, vector<1x16x16xf32>
    %62 = vector.shape_cast %61 : vector<1x16x16xf32> to vector<16x16xf32>
    %c1_82 = arith.constant 1 : index
    %c1_83 = arith.constant 1 : index
    %c1_84 = arith.constant 1 : index
    %63 = vector.load %arg9[%c1_82, %c1_83, %c1_84] : memref<3x18x18xf32, #tpu.memory_space<vmem>>, vector<1x16x16xf32>
    %64 = vector.shape_cast %63 : vector<1x16x16xf32> to vector<16x16xf32>
    %c2_85 = arith.constant 2 : index
    %c1_86 = arith.constant 1 : index
    %c1_87 = arith.constant 1 : index
    %65 = vector.load %arg9[%c2_85, %c1_86, %c1_87] : memref<3x18x18xf32, #tpu.memory_space<vmem>>, vector<1x16x16xf32>
    %66 = vector.shape_cast %65 : vector<1x16x16xf32> to vector<16x16xf32>
    %c0_88 = arith.constant 0 : index
    %c1_89 = arith.constant 1 : index
    %c2_90 = arith.constant 2 : index
    %67 = vector.load %arg9[%c0_88, %c1_89, %c2_90] : memref<3x18x18xf32, #tpu.memory_space<vmem>>, vector<1x16x16xf32>
    %68 = vector.shape_cast %67 : vector<1x16x16xf32> to vector<16x16xf32>
    %c1_91 = arith.constant 1 : index
    %c1_92 = arith.constant 1 : index
    %c2_93 = arith.constant 2 : index
    %69 = vector.load %arg9[%c1_91, %c1_92, %c2_93] : memref<3x18x18xf32, #tpu.memory_space<vmem>>, vector<1x16x16xf32>
    %70 = vector.shape_cast %69 : vector<1x16x16xf32> to vector<16x16xf32>
    %c2_94 = arith.constant 2 : index
    %c1_95 = arith.constant 1 : index
    %c2_96 = arith.constant 2 : index
    %71 = vector.load %arg9[%c2_94, %c1_95, %c2_96] : memref<3x18x18xf32, #tpu.memory_space<vmem>>, vector<1x16x16xf32>
    %72 = vector.shape_cast %71 : vector<1x16x16xf32> to vector<16x16xf32>
    %c0_97 = arith.constant 0 : index
    %c2_98 = arith.constant 2 : index
    %c0_99 = arith.constant 0 : index
    %73 = vector.load %arg9[%c0_97, %c2_98, %c0_99] : memref<3x18x18xf32, #tpu.memory_space<vmem>>, vector<1x16x16xf32>
    %74 = vector.shape_cast %73 : vector<1x16x16xf32> to vector<16x16xf32>
    %c1_100 = arith.constant 1 : index
    %c2_101 = arith.constant 2 : index
    %c0_102 = arith.constant 0 : index
    %75 = vector.load %arg9[%c1_100, %c2_101, %c0_102] : memref<3x18x18xf32, #tpu.memory_space<vmem>>, vector<1x16x16xf32>
    %76 = vector.shape_cast %75 : vector<1x16x16xf32> to vector<16x16xf32>
    %c2_103 = arith.constant 2 : index
    %c2_104 = arith.constant 2 : index
    %c0_105 = arith.constant 0 : index
    %77 = vector.load %arg9[%c2_103, %c2_104, %c0_105] : memref<3x18x18xf32, #tpu.memory_space<vmem>>, vector<1x16x16xf32>
    %78 = vector.shape_cast %77 : vector<1x16x16xf32> to vector<16x16xf32>
    %c0_106 = arith.constant 0 : index
    %c2_107 = arith.constant 2 : index
    %c1_108 = arith.constant 1 : index
    %79 = vector.load %arg9[%c0_106, %c2_107, %c1_108] : memref<3x18x18xf32, #tpu.memory_space<vmem>>, vector<1x16x16xf32>
    %80 = vector.shape_cast %79 : vector<1x16x16xf32> to vector<16x16xf32>
    %c1_109 = arith.constant 1 : index
    %c2_110 = arith.constant 2 : index
    %c1_111 = arith.constant 1 : index
    %81 = vector.load %arg9[%c1_109, %c2_110, %c1_111] : memref<3x18x18xf32, #tpu.memory_space<vmem>>, vector<1x16x16xf32>
    %82 = vector.shape_cast %81 : vector<1x16x16xf32> to vector<16x16xf32>
    %c2_112 = arith.constant 2 : index
    %c2_113 = arith.constant 2 : index
    %c1_114 = arith.constant 1 : index
    %83 = vector.load %arg9[%c2_112, %c2_113, %c1_114] : memref<3x18x18xf32, #tpu.memory_space<vmem>>, vector<1x16x16xf32>
    %84 = vector.shape_cast %83 : vector<1x16x16xf32> to vector<16x16xf32>
    %c0_115 = arith.constant 0 : index
    %c2_116 = arith.constant 2 : index
    %c2_117 = arith.constant 2 : index
    %85 = vector.load %arg9[%c0_115, %c2_116, %c2_117] : memref<3x18x18xf32, #tpu.memory_space<vmem>>, vector<1x16x16xf32>
    %86 = vector.shape_cast %85 : vector<1x16x16xf32> to vector<16x16xf32>
    %c1_118 = arith.constant 1 : index
    %c2_119 = arith.constant 2 : index
    %c2_120 = arith.constant 2 : index
    %87 = vector.load %arg9[%c1_118, %c2_119, %c2_120] : memref<3x18x18xf32, #tpu.memory_space<vmem>>, vector<1x16x16xf32>
    %88 = vector.shape_cast %87 : vector<1x16x16xf32> to vector<16x16xf32>
    %c2_121 = arith.constant 2 : index
    %c2_122 = arith.constant 2 : index
    %c2_123 = arith.constant 2 : index
    %89 = vector.load %arg9[%c2_121, %c2_122, %c2_123] : memref<3x18x18xf32, #tpu.memory_space<vmem>>, vector<1x16x16xf32>
    %90 = vector.shape_cast %89 : vector<1x16x16xf32> to vector<16x16xf32>
    %c0_i32 = arith.constant 0 : i32
    %c32_i32 = arith.constant 32 : i32
    %91 = arith.addi %c0_i32, %c32_i32 : i32
    %c1_i32 = arith.constant 1 : i32
    scf.for %arg11 = %c0_i32 to %91 step %c1_i32  : i32 {
      %c27_i32 = arith.constant 27 : i32
      %114 = arith.muli %arg11, %c27_i32 : i32
      %115 = arith.index_cast %114 : i32 to index
      %116 = memref.load %arg2[%115] : memref<864xf32, #tpu.memory_space<smem>>
      %117 = vector.broadcast %116 : f32 to vector<16x16xf32>
      %118 = arith.mulf %38, %117 : vector<16x16xf32>
      %c1_i32_140 = arith.constant 1 : i32
      %119 = arith.addi %114, %c1_i32_140 : i32
      %120 = arith.index_cast %119 : i32 to index
      %121 = memref.load %arg2[%120] : memref<864xf32, #tpu.memory_space<smem>>
      %122 = vector.broadcast %121 : f32 to vector<16x16xf32>
      %123 = arith.mulf %40, %122 : vector<16x16xf32>
      %124 = arith.addf %118, %123 : vector<16x16xf32>
      %c2_i32 = arith.constant 2 : i32
      %125 = arith.addi %114, %c2_i32 : i32
      %126 = arith.index_cast %125 : i32 to index
      %127 = memref.load %arg2[%126] : memref<864xf32, #tpu.memory_space<smem>>
      %128 = vector.broadcast %127 : f32 to vector<16x16xf32>
      %129 = arith.mulf %42, %128 : vector<16x16xf32>
      %130 = arith.addf %124, %129 : vector<16x16xf32>
      %c3_i32 = arith.constant 3 : i32
      %131 = arith.addi %114, %c3_i32 : i32
      %132 = arith.index_cast %131 : i32 to index
      %133 = memref.load %arg2[%132] : memref<864xf32, #tpu.memory_space<smem>>
      %134 = vector.broadcast %133 : f32 to vector<16x16xf32>
      %135 = arith.mulf %44, %134 : vector<16x16xf32>
      %136 = arith.addf %130, %135 : vector<16x16xf32>
      %c4_i32 = arith.constant 4 : i32
      %137 = arith.addi %114, %c4_i32 : i32
      %138 = arith.index_cast %137 : i32 to index
      %139 = memref.load %arg2[%138] : memref<864xf32, #tpu.memory_space<smem>>
      %140 = vector.broadcast %139 : f32 to vector<16x16xf32>
      %141 = arith.mulf %46, %140 : vector<16x16xf32>
      %142 = arith.addf %136, %141 : vector<16x16xf32>
      %c5_i32 = arith.constant 5 : i32
      %143 = arith.addi %114, %c5_i32 : i32
      %144 = arith.index_cast %143 : i32 to index
      %145 = memref.load %arg2[%144] : memref<864xf32, #tpu.memory_space<smem>>
      %146 = vector.broadcast %145 : f32 to vector<16x16xf32>
      %147 = arith.mulf %48, %146 : vector<16x16xf32>
      %148 = arith.addf %142, %147 : vector<16x16xf32>
      %c6_i32 = arith.constant 6 : i32
      %149 = arith.addi %114, %c6_i32 : i32
      %150 = arith.index_cast %149 : i32 to index
      %151 = memref.load %arg2[%150] : memref<864xf32, #tpu.memory_space<smem>>
      %152 = vector.broadcast %151 : f32 to vector<16x16xf32>
      %153 = arith.mulf %50, %152 : vector<16x16xf32>
      %154 = arith.addf %148, %153 : vector<16x16xf32>
      %c7_i32 = arith.constant 7 : i32
      %155 = arith.addi %114, %c7_i32 : i32
      %156 = arith.index_cast %155 : i32 to index
      %157 = memref.load %arg2[%156] : memref<864xf32, #tpu.memory_space<smem>>
      %158 = vector.broadcast %157 : f32 to vector<16x16xf32>
      %159 = arith.mulf %52, %158 : vector<16x16xf32>
      %160 = arith.addf %154, %159 : vector<16x16xf32>
      %c8_i32 = arith.constant 8 : i32
      %161 = arith.addi %114, %c8_i32 : i32
      %162 = arith.index_cast %161 : i32 to index
      %163 = memref.load %arg2[%162] : memref<864xf32, #tpu.memory_space<smem>>
      %164 = vector.broadcast %163 : f32 to vector<16x16xf32>
      %165 = arith.mulf %54, %164 : vector<16x16xf32>
      %166 = arith.addf %160, %165 : vector<16x16xf32>
      %c9_i32 = arith.constant 9 : i32
      %167 = arith.addi %114, %c9_i32 : i32
      %168 = arith.index_cast %167 : i32 to index
      %169 = memref.load %arg2[%168] : memref<864xf32, #tpu.memory_space<smem>>
      %170 = vector.broadcast %169 : f32 to vector<16x16xf32>
      %171 = arith.mulf %56, %170 : vector<16x16xf32>
      %172 = arith.addf %166, %171 : vector<16x16xf32>
      %c10_i32 = arith.constant 10 : i32
      %173 = arith.addi %114, %c10_i32 : i32
      %174 = arith.index_cast %173 : i32 to index
      %175 = memref.load %arg2[%174] : memref<864xf32, #tpu.memory_space<smem>>
      %176 = vector.broadcast %175 : f32 to vector<16x16xf32>
      %177 = arith.mulf %58, %176 : vector<16x16xf32>
      %178 = arith.addf %172, %177 : vector<16x16xf32>
      %c11_i32 = arith.constant 11 : i32
      %179 = arith.addi %114, %c11_i32 : i32
      %180 = arith.index_cast %179 : i32 to index
      %181 = memref.load %arg2[%180] : memref<864xf32, #tpu.memory_space<smem>>
      %182 = vector.broadcast %181 : f32 to vector<16x16xf32>
      %183 = arith.mulf %60, %182 : vector<16x16xf32>
      %184 = arith.addf %178, %183 : vector<16x16xf32>
      %c12_i32 = arith.constant 12 : i32
      %185 = arith.addi %114, %c12_i32 : i32
      %186 = arith.index_cast %185 : i32 to index
      %187 = memref.load %arg2[%186] : memref<864xf32, #tpu.memory_space<smem>>
      %188 = vector.broadcast %187 : f32 to vector<16x16xf32>
      %189 = arith.mulf %62, %188 : vector<16x16xf32>
      %190 = arith.addf %184, %189 : vector<16x16xf32>
      %c13_i32 = arith.constant 13 : i32
      %191 = arith.addi %114, %c13_i32 : i32
      %192 = arith.index_cast %191 : i32 to index
      %193 = memref.load %arg2[%192] : memref<864xf32, #tpu.memory_space<smem>>
      %194 = vector.broadcast %193 : f32 to vector<16x16xf32>
      %195 = arith.mulf %64, %194 : vector<16x16xf32>
      %196 = arith.addf %190, %195 : vector<16x16xf32>
      %c14_i32 = arith.constant 14 : i32
      %197 = arith.addi %114, %c14_i32 : i32
      %198 = arith.index_cast %197 : i32 to index
      %199 = memref.load %arg2[%198] : memref<864xf32, #tpu.memory_space<smem>>
      %200 = vector.broadcast %199 : f32 to vector<16x16xf32>
      %201 = arith.mulf %66, %200 : vector<16x16xf32>
      %202 = arith.addf %196, %201 : vector<16x16xf32>
      %c15_i32 = arith.constant 15 : i32
      %203 = arith.addi %114, %c15_i32 : i32
      %204 = arith.index_cast %203 : i32 to index
      %205 = memref.load %arg2[%204] : memref<864xf32, #tpu.memory_space<smem>>
      %206 = vector.broadcast %205 : f32 to vector<16x16xf32>
      %207 = arith.mulf %68, %206 : vector<16x16xf32>
      %208 = arith.addf %202, %207 : vector<16x16xf32>
      %c16_i32 = arith.constant 16 : i32
      %209 = arith.addi %114, %c16_i32 : i32
      %210 = arith.index_cast %209 : i32 to index
      %211 = memref.load %arg2[%210] : memref<864xf32, #tpu.memory_space<smem>>
      %212 = vector.broadcast %211 : f32 to vector<16x16xf32>
      %213 = arith.mulf %70, %212 : vector<16x16xf32>
      %214 = arith.addf %208, %213 : vector<16x16xf32>
      %c17_i32 = arith.constant 17 : i32
      %215 = arith.addi %114, %c17_i32 : i32
      %216 = arith.index_cast %215 : i32 to index
      %217 = memref.load %arg2[%216] : memref<864xf32, #tpu.memory_space<smem>>
      %218 = vector.broadcast %217 : f32 to vector<16x16xf32>
      %219 = arith.mulf %72, %218 : vector<16x16xf32>
      %220 = arith.addf %214, %219 : vector<16x16xf32>
      %c18_i32 = arith.constant 18 : i32
      %221 = arith.addi %114, %c18_i32 : i32
      %222 = arith.index_cast %221 : i32 to index
      %223 = memref.load %arg2[%222] : memref<864xf32, #tpu.memory_space<smem>>
      %224 = vector.broadcast %223 : f32 to vector<16x16xf32>
      %225 = arith.mulf %74, %224 : vector<16x16xf32>
      %226 = arith.addf %220, %225 : vector<16x16xf32>
      %c19_i32 = arith.constant 19 : i32
      %227 = arith.addi %114, %c19_i32 : i32
      %228 = arith.index_cast %227 : i32 to index
      %229 = memref.load %arg2[%228] : memref<864xf32, #tpu.memory_space<smem>>
      %230 = vector.broadcast %229 : f32 to vector<16x16xf32>
      %231 = arith.mulf %76, %230 : vector<16x16xf32>
      %232 = arith.addf %226, %231 : vector<16x16xf32>
      %c20_i32 = arith.constant 20 : i32
      %233 = arith.addi %114, %c20_i32 : i32
      %234 = arith.index_cast %233 : i32 to index
      %235 = memref.load %arg2[%234] : memref<864xf32, #tpu.memory_space<smem>>
      %236 = vector.broadcast %235 : f32 to vector<16x16xf32>
      %237 = arith.mulf %78, %236 : vector<16x16xf32>
      %238 = arith.addf %232, %237 : vector<16x16xf32>
      %c21_i32 = arith.constant 21 : i32
      %239 = arith.addi %114, %c21_i32 : i32
      %240 = arith.index_cast %239 : i32 to index
      %241 = memref.load %arg2[%240] : memref<864xf32, #tpu.memory_space<smem>>
      %242 = vector.broadcast %241 : f32 to vector<16x16xf32>
      %243 = arith.mulf %80, %242 : vector<16x16xf32>
      %244 = arith.addf %238, %243 : vector<16x16xf32>
      %c22_i32 = arith.constant 22 : i32
      %245 = arith.addi %114, %c22_i32 : i32
      %246 = arith.index_cast %245 : i32 to index
      %247 = memref.load %arg2[%246] : memref<864xf32, #tpu.memory_space<smem>>
      %248 = vector.broadcast %247 : f32 to vector<16x16xf32>
      %249 = arith.mulf %82, %248 : vector<16x16xf32>
      %250 = arith.addf %244, %249 : vector<16x16xf32>
      %c23_i32 = arith.constant 23 : i32
      %251 = arith.addi %114, %c23_i32 : i32
      %252 = arith.index_cast %251 : i32 to index
      %253 = memref.load %arg2[%252] : memref<864xf32, #tpu.memory_space<smem>>
      %254 = vector.broadcast %253 : f32 to vector<16x16xf32>
      %255 = arith.mulf %84, %254 : vector<16x16xf32>
      %256 = arith.addf %250, %255 : vector<16x16xf32>
      %c24_i32 = arith.constant 24 : i32
      %257 = arith.addi %114, %c24_i32 : i32
      %258 = arith.index_cast %257 : i32 to index
      %259 = memref.load %arg2[%258] : memref<864xf32, #tpu.memory_space<smem>>
      %260 = vector.broadcast %259 : f32 to vector<16x16xf32>
      %261 = arith.mulf %86, %260 : vector<16x16xf32>
      %262 = arith.addf %256, %261 : vector<16x16xf32>
      %c25_i32 = arith.constant 25 : i32
      %263 = arith.addi %114, %c25_i32 : i32
      %264 = arith.index_cast %263 : i32 to index
      %265 = memref.load %arg2[%264] : memref<864xf32, #tpu.memory_space<smem>>
      %266 = vector.broadcast %265 : f32 to vector<16x16xf32>
      %267 = arith.mulf %88, %266 : vector<16x16xf32>
      %268 = arith.addf %262, %267 : vector<16x16xf32>
      %c26_i32 = arith.constant 26 : i32
      %269 = arith.addi %114, %c26_i32 : i32
      %270 = arith.index_cast %269 : i32 to index
      %271 = memref.load %arg2[%270] : memref<864xf32, #tpu.memory_space<smem>>
      %272 = vector.broadcast %271 : f32 to vector<16x16xf32>
      %273 = arith.mulf %90, %272 : vector<16x16xf32>
      %274 = arith.addf %268, %273 : vector<16x16xf32>
      %275 = arith.index_cast %arg11 : i32 to index
      %276 = memref.load %arg3[%275] : memref<32xf32, #tpu.memory_space<smem>>
      %277 = vector.broadcast %276 : f32 to vector<16x16xf32>
      %278 = arith.addf %274, %277 : vector<16x16xf32>
      %cst_141 = arith.constant 0.000000e+00 : f32
      %279 = vector.broadcast %cst_141 : f32 to vector<16x16xf32>
      %280 = arith.maximumf %278, %279 : vector<16x16xf32>
      %281 = arith.index_cast %arg11 : i32 to index
      %c1_142 = arith.constant 1 : index
      %c1_143 = arith.constant 1 : index
      %282 = vector.load %arg10[%281, %c1_142, %c1_143] : memref<32x18x18xf32, #tpu.memory_space<vmem>>, vector<1x16x16xf32>
      %283 = vector.shape_cast %282 : vector<1x16x16xf32> to vector<16x16xf32>
      %284 = vector.shape_cast %280 : vector<16x16xf32> to vector<1x16x16xf32>
      tpu.vector_store %arg10[%281, %c1_142, %c1_143], %284 {strides = array<i32>} : memref<32x18x18xf32, #tpu.memory_space<vmem>>, vector<1x16x16xf32>,
    }
    %c32_i32_124 = arith.constant 32 : i32
    %cst_125 = arith.constant 0.000000e+00 : f32
    %92 = vector.broadcast %cst_125 : f32 to vector<16x16xf32>
    %cst_126 = arith.constant 0.000000e+00 : f32
    %93 = vector.broadcast %cst_126 : f32 to vector<16x16xf32>
    %c0_i32_127 = arith.constant 0 : i32
    %c32_i32_128 = arith.constant 32 : i32
    %94 = arith.addi %c0_i32_127, %c32_i32_128 : i32
    %c1_i32_129 = arith.constant 1 : i32
    %95:2 = scf.for %arg11 = %c0_i32_127 to %94 step %c1_i32_129 iter_args(%arg12 = %92, %arg13 = %93) -> (vector<16x16xf32>, vector<16x16xf32>)  : i32 {
      %c9_i32 = arith.constant 9 : i32
      %114 = arith.muli %arg11, %c9_i32 : i32
      %115 = arith.index_cast %arg11 : i32 to index
      %c0_140 = arith.constant 0 : index
      %c0_141 = arith.constant 0 : index
      %116 = vector.load %arg10[%115, %c0_140, %c0_141] : memref<32x18x18xf32, #tpu.memory_space<vmem>>, vector<1x16x16xf32>
      %117 = vector.shape_cast %116 : vector<1x16x16xf32> to vector<16x16xf32>
      %c0_i32_142 = arith.constant 0 : i32
      %118 = arith.addi %114, %c0_i32_142 : i32
      %119 = arith.index_cast %118 : i32 to index
      %120 = memref.load %arg4[%119] : memref<288xf32, #tpu.memory_space<smem>>
      %121 = vector.broadcast %120 : f32 to vector<16x16xf32>
      %122 = arith.mulf %117, %121 : vector<16x16xf32>
      %123 = arith.addf %arg12, %122 : vector<16x16xf32>
      %c0_i32_143 = arith.constant 0 : i32
      %124 = arith.addi %114, %c0_i32_143 : i32
      %125 = arith.index_cast %124 : i32 to index
      %126 = memref.load %arg5[%125] : memref<288xf32, #tpu.memory_space<smem>>
      %127 = vector.broadcast %126 : f32 to vector<16x16xf32>
      %128 = arith.mulf %117, %127 : vector<16x16xf32>
      %129 = arith.addf %arg13, %128 : vector<16x16xf32>
      %130 = arith.index_cast %arg11 : i32 to index
      %c0_144 = arith.constant 0 : index
      %c1_145 = arith.constant 1 : index
      %131 = vector.load %arg10[%130, %c0_144, %c1_145] : memref<32x18x18xf32, #tpu.memory_space<vmem>>, vector<1x16x16xf32>
      %132 = vector.shape_cast %131 : vector<1x16x16xf32> to vector<16x16xf32>
      %c1_i32_146 = arith.constant 1 : i32
      %133 = arith.addi %114, %c1_i32_146 : i32
      %134 = arith.index_cast %133 : i32 to index
      %135 = memref.load %arg4[%134] : memref<288xf32, #tpu.memory_space<smem>>
      %136 = vector.broadcast %135 : f32 to vector<16x16xf32>
      %137 = arith.mulf %132, %136 : vector<16x16xf32>
      %138 = arith.addf %123, %137 : vector<16x16xf32>
      %c1_i32_147 = arith.constant 1 : i32
      %139 = arith.addi %114, %c1_i32_147 : i32
      %140 = arith.index_cast %139 : i32 to index
      %141 = memref.load %arg5[%140] : memref<288xf32, #tpu.memory_space<smem>>
      %142 = vector.broadcast %141 : f32 to vector<16x16xf32>
      %143 = arith.mulf %132, %142 : vector<16x16xf32>
      %144 = arith.addf %129, %143 : vector<16x16xf32>
      %145 = arith.index_cast %arg11 : i32 to index
      %c0_148 = arith.constant 0 : index
      %c2_149 = arith.constant 2 : index
      %146 = vector.load %arg10[%145, %c0_148, %c2_149] : memref<32x18x18xf32, #tpu.memory_space<vmem>>, vector<1x16x16xf32>
      %147 = vector.shape_cast %146 : vector<1x16x16xf32> to vector<16x16xf32>
      %c2_i32 = arith.constant 2 : i32
      %148 = arith.addi %114, %c2_i32 : i32
      %149 = arith.index_cast %148 : i32 to index
      %150 = memref.load %arg4[%149] : memref<288xf32, #tpu.memory_space<smem>>
      %151 = vector.broadcast %150 : f32 to vector<16x16xf32>
      %152 = arith.mulf %147, %151 : vector<16x16xf32>
      %153 = arith.addf %138, %152 : vector<16x16xf32>
      %c2_i32_150 = arith.constant 2 : i32
      %154 = arith.addi %114, %c2_i32_150 : i32
      %155 = arith.index_cast %154 : i32 to index
      %156 = memref.load %arg5[%155] : memref<288xf32, #tpu.memory_space<smem>>
      %157 = vector.broadcast %156 : f32 to vector<16x16xf32>
      %158 = arith.mulf %147, %157 : vector<16x16xf32>
      %159 = arith.addf %144, %158 : vector<16x16xf32>
      %160 = arith.index_cast %arg11 : i32 to index
      %c1_151 = arith.constant 1 : index
      %c0_152 = arith.constant 0 : index
      %161 = vector.load %arg10[%160, %c1_151, %c0_152] : memref<32x18x18xf32, #tpu.memory_space<vmem>>, vector<1x16x16xf32>
      %162 = vector.shape_cast %161 : vector<1x16x16xf32> to vector<16x16xf32>
      %c3_i32 = arith.constant 3 : i32
      %163 = arith.addi %114, %c3_i32 : i32
      %164 = arith.index_cast %163 : i32 to index
      %165 = memref.load %arg4[%164] : memref<288xf32, #tpu.memory_space<smem>>
      %166 = vector.broadcast %165 : f32 to vector<16x16xf32>
      %167 = arith.mulf %162, %166 : vector<16x16xf32>
      %168 = arith.addf %153, %167 : vector<16x16xf32>
      %c3_i32_153 = arith.constant 3 : i32
      %169 = arith.addi %114, %c3_i32_153 : i32
      %170 = arith.index_cast %169 : i32 to index
      %171 = memref.load %arg5[%170] : memref<288xf32, #tpu.memory_space<smem>>
      %172 = vector.broadcast %171 : f32 to vector<16x16xf32>
      %173 = arith.mulf %162, %172 : vector<16x16xf32>
      %174 = arith.addf %159, %173 : vector<16x16xf32>
      %175 = arith.index_cast %arg11 : i32 to index
      %c1_154 = arith.constant 1 : index
      %c1_155 = arith.constant 1 : index
      %176 = vector.load %arg10[%175, %c1_154, %c1_155] : memref<32x18x18xf32, #tpu.memory_space<vmem>>, vector<1x16x16xf32>
      %177 = vector.shape_cast %176 : vector<1x16x16xf32> to vector<16x16xf32>
      %c4_i32 = arith.constant 4 : i32
      %178 = arith.addi %114, %c4_i32 : i32
      %179 = arith.index_cast %178 : i32 to index
      %180 = memref.load %arg4[%179] : memref<288xf32, #tpu.memory_space<smem>>
      %181 = vector.broadcast %180 : f32 to vector<16x16xf32>
      %182 = arith.mulf %177, %181 : vector<16x16xf32>
      %183 = arith.addf %168, %182 : vector<16x16xf32>
      %c4_i32_156 = arith.constant 4 : i32
      %184 = arith.addi %114, %c4_i32_156 : i32
      %185 = arith.index_cast %184 : i32 to index
      %186 = memref.load %arg5[%185] : memref<288xf32, #tpu.memory_space<smem>>
      %187 = vector.broadcast %186 : f32 to vector<16x16xf32>
      %188 = arith.mulf %177, %187 : vector<16x16xf32>
      %189 = arith.addf %174, %188 : vector<16x16xf32>
      %190 = arith.index_cast %arg11 : i32 to index
      %c1_157 = arith.constant 1 : index
      %c2_158 = arith.constant 2 : index
      %191 = vector.load %arg10[%190, %c1_157, %c2_158] : memref<32x18x18xf32, #tpu.memory_space<vmem>>, vector<1x16x16xf32>
      %192 = vector.shape_cast %191 : vector<1x16x16xf32> to vector<16x16xf32>
      %c5_i32 = arith.constant 5 : i32
      %193 = arith.addi %114, %c5_i32 : i32
      %194 = arith.index_cast %193 : i32 to index
      %195 = memref.load %arg4[%194] : memref<288xf32, #tpu.memory_space<smem>>
      %196 = vector.broadcast %195 : f32 to vector<16x16xf32>
      %197 = arith.mulf %192, %196 : vector<16x16xf32>
      %198 = arith.addf %183, %197 : vector<16x16xf32>
      %c5_i32_159 = arith.constant 5 : i32
      %199 = arith.addi %114, %c5_i32_159 : i32
      %200 = arith.index_cast %199 : i32 to index
      %201 = memref.load %arg5[%200] : memref<288xf32, #tpu.memory_space<smem>>
      %202 = vector.broadcast %201 : f32 to vector<16x16xf32>
      %203 = arith.mulf %192, %202 : vector<16x16xf32>
      %204 = arith.addf %189, %203 : vector<16x16xf32>
      %205 = arith.index_cast %arg11 : i32 to index
      %c2_160 = arith.constant 2 : index
      %c0_161 = arith.constant 0 : index
      %206 = vector.load %arg10[%205, %c2_160, %c0_161] : memref<32x18x18xf32, #tpu.memory_space<vmem>>, vector<1x16x16xf32>
      %207 = vector.shape_cast %206 : vector<1x16x16xf32> to vector<16x16xf32>
      %c6_i32 = arith.constant 6 : i32
      %208 = arith.addi %114, %c6_i32 : i32
      %209 = arith.index_cast %208 : i32 to index
      %210 = memref.load %arg4[%209] : memref<288xf32, #tpu.memory_space<smem>>
      %211 = vector.broadcast %210 : f32 to vector<16x16xf32>
      %212 = arith.mulf %207, %211 : vector<16x16xf32>
      %213 = arith.addf %198, %212 : vector<16x16xf32>
      %c6_i32_162 = arith.constant 6 : i32
      %214 = arith.addi %114, %c6_i32_162 : i32
      %215 = arith.index_cast %214 : i32 to index
      %216 = memref.load %arg5[%215] : memref<288xf32, #tpu.memory_space<smem>>
      %217 = vector.broadcast %216 : f32 to vector<16x16xf32>
      %218 = arith.mulf %207, %217 : vector<16x16xf32>
      %219 = arith.addf %204, %218 : vector<16x16xf32>
      %220 = arith.index_cast %arg11 : i32 to index
      %c2_163 = arith.constant 2 : index
      %c1_164 = arith.constant 1 : index
      %221 = vector.load %arg10[%220, %c2_163, %c1_164] : memref<32x18x18xf32, #tpu.memory_space<vmem>>, vector<1x16x16xf32>
      %222 = vector.shape_cast %221 : vector<1x16x16xf32> to vector<16x16xf32>
      %c7_i32 = arith.constant 7 : i32
      %223 = arith.addi %114, %c7_i32 : i32
      %224 = arith.index_cast %223 : i32 to index
      %225 = memref.load %arg4[%224] : memref<288xf32, #tpu.memory_space<smem>>
      %226 = vector.broadcast %225 : f32 to vector<16x16xf32>
      %227 = arith.mulf %222, %226 : vector<16x16xf32>
      %228 = arith.addf %213, %227 : vector<16x16xf32>
      %c7_i32_165 = arith.constant 7 : i32
      %229 = arith.addi %114, %c7_i32_165 : i32
      %230 = arith.index_cast %229 : i32 to index
      %231 = memref.load %arg5[%230] : memref<288xf32, #tpu.memory_space<smem>>
      %232 = vector.broadcast %231 : f32 to vector<16x16xf32>
      %233 = arith.mulf %222, %232 : vector<16x16xf32>
      %234 = arith.addf %219, %233 : vector<16x16xf32>
      %235 = arith.index_cast %arg11 : i32 to index
      %c2_166 = arith.constant 2 : index
      %c2_167 = arith.constant 2 : index
      %236 = vector.load %arg10[%235, %c2_166, %c2_167] : memref<32x18x18xf32, #tpu.memory_space<vmem>>, vector<1x16x16xf32>
      %237 = vector.shape_cast %236 : vector<1x16x16xf32> to vector<16x16xf32>
      %c8_i32 = arith.constant 8 : i32
      %238 = arith.addi %114, %c8_i32 : i32
      %239 = arith.index_cast %238 : i32 to index
      %240 = memref.load %arg4[%239] : memref<288xf32, #tpu.memory_space<smem>>
      %241 = vector.broadcast %240 : f32 to vector<16x16xf32>
      %242 = arith.mulf %237, %241 : vector<16x16xf32>
      %243 = arith.addf %228, %242 : vector<16x16xf32>
      %c8_i32_168 = arith.constant 8 : i32
      %244 = arith.addi %114, %c8_i32_168 : i32
      %245 = arith.index_cast %244 : i32 to index
      %246 = memref.load %arg5[%245] : memref<288xf32, #tpu.memory_space<smem>>
      %247 = vector.broadcast %246 : f32 to vector<16x16xf32>
      %248 = arith.mulf %237, %247 : vector<16x16xf32>
      %249 = arith.addf %234, %248 : vector<16x16xf32>
      scf.yield %243, %249 : vector<16x16xf32>, vector<16x16xf32>
    }
    %c32_i32_130 = arith.constant 32 : i32
    %c0_131 = arith.constant 0 : index
    %96 = memref.load %arg6[%c0_131] : memref<2xf32, #tpu.memory_space<smem>>
    %97 = vector.broadcast %96 : f32 to vector<16x16xf32>
    %98 = arith.addf %95#0, %97 : vector<16x16xf32>
    %99 = arith.addf %98, %22 : vector<16x16xf32>
    %cst_132 = arith.constant 9.99999974E-5 : f32
    %100 = vector.broadcast %cst_132 : f32 to vector<16x16xf32>
    %101 = arith.mulf %99, %100 : vector<16x16xf32>
    %c1_133 = arith.constant 1 : index
    %102 = memref.load %arg6[%c1_133] : memref<2xf32, #tpu.memory_space<smem>>
    %103 = vector.broadcast %102 : f32 to vector<16x16xf32>
    %104 = arith.addf %95#1, %103 : vector<16x16xf32>
    %105 = arith.addf %104, %26 : vector<16x16xf32>
    %cst_134 = arith.constant 9.99999974E-5 : f32
    %106 = vector.broadcast %cst_134 : f32 to vector<16x16xf32>
    %107 = arith.mulf %105, %106 : vector<16x16xf32>
    %c0_135 = arith.constant 0 : index
    %c0_136 = arith.constant 0 : index
    %c0_137 = arith.constant 0 : index
    %108 = vector.load %arg8[%c0_135, %c0_136, %c0_137] : memref<1x16x32xf32, #tpu.memory_space<vmem>>, vector<1x16x16xf32>
    %109 = vector.shape_cast %108 : vector<1x16x16xf32> to vector<16x16xf32>
    %110 = vector.shape_cast %101 : vector<16x16xf32> to vector<1x16x16xf32>
    tpu.vector_store %arg8[%c0_135, %c0_136, %c0_137], %110 {strides = array<i32>} : memref<1x16x32xf32, #tpu.memory_space<vmem>>, vector<1x16x16xf32>,
    %c0_138 = arith.constant 0 : index
    %c0_139 = arith.constant 0 : index
    %c16 = arith.constant 16 : index
    %111 = vector.load %arg8[%c0_138, %c0_139, %c16] : memref<1x16x32xf32, #tpu.memory_space<vmem>>, vector<1x16x16xf32>
    %112 = vector.shape_cast %111 : vector<1x16x16xf32> to vector<16x16xf32>
    %113 = vector.shape_cast %107 : vector<16x16xf32> to vector<1x16x16xf32>
    tpu.vector_store %arg8[%c0_138, %c0_139, %c16], %113 {strides = array<i32>} : memref<1x16x32xf32, #tpu.memory_space<vmem>>, vector<1x16x16xf32>,
    return
  }
  func.func @transform_0(%arg0: i32) -> i32 {
    %c0_i32 = arith.constant 0 : i32
    %c0_i32_0 = arith.constant 0 : i32
    return %c0_i32 : i32
  }
  func.func @transform_1(%arg0: i32) -> i32 {
    %c0_i32 = arith.constant 0 : i32
    %c0_i32_0 = arith.constant 0 : i32
    return %c0_i32 : i32
  }
  func.func @transform_2(%arg0: i32) -> i32 {
    %c0_i32 = arith.constant 0 : i32
    %c0_i32_0 = arith.constant 0 : i32
    return %c0_i32 : i32
  }
  func.func @transform_3(%arg0: i32) -> i32 {
    %c0_i32 = arith.constant 0 : i32
    %c0_i32_0 = arith.constant 0 : i32
    return %c0_i32 : i32
  }
  func.func @transform_4(%arg0: i32) -> i32 {
    %c0_i32 = arith.constant 0 : i32
    %c0_i32_0 = arith.constant 0 : i32
    return %c0_i32 : i32
  }
  func.func @transform_5(%arg0: i32) -> i32 {
    %c0_i32 = arith.constant 0 : i32
    %c0_i32_0 = arith.constant 0 : i32
    return %c0_i32 : i32
  }
  func.func @transform_6(%arg0: i32) -> (i32, i32, i32, i32) {
    %c0_i32 = arith.constant 0 : i32
    %c0_i32_0 = arith.constant 0 : i32
    %c0_i32_1 = arith.constant 0 : i32
    %c0_i32_2 = arith.constant 0 : i32
    return %arg0, %c0_i32, %c0_i32_0, %c0_i32_1 : i32, i32, i32, i32
  }
  func.func @transform_7(%arg0: i32) -> (i32, i32, i32) {
    %c0_i32 = arith.constant 0 : i32
    %c0_i32_0 = arith.constant 0 : i32
    %c0_i32_1 = arith.constant 0 : i32
    return %arg0, %c0_i32, %c0_i32_0 : i32, i32, i32
  }
}

</mosaic_0001>

<bundles_post_ra>
// kernel: custom-call.1
= control target key start
LH: loop header
LB: loop body
LE: loop exit
PB: predicated region body
PF: predicated region fallthrough
CT: control target
= control target key end

     0   :  { %s56_s0 = inlined_call_operand.hbm [shape: c64[1,2,16,16], index: 0, kind: input, shape index: {}]   ;;  %s57_s1 = inlined_call_operand.vmem [shape: f32[1,2,16,16], index: 1, kind: output, shape index: {}]  }
   0x1   :  { %s2_s8 = scalar_lea.hbm %s56_s0, 32 }
   0x2   :  { %3 = vsyncpa [#allocation0], 0  ;;  %s5_s9 = sshll.u32 %s2_s8, 4  ;;  %s7_s12 = sshll.u32 %s57_s1, 4  ;;  %s6_s9 = int_to_ptr.hbm [resolvable:$true] %s5_s9  ;;  %s8_s12 = int_to_ptr.vmem [resolvable:$true] %s7_s12 }
   0x3   :  { %10 = dma.hbm_to_vmem [thread:$0]  %s6_s9, 512, %s8_s12, [#allocation0] }
   0x4   :  { %38 = dma.done.wait [#allocation0], 512  }
   0x5   :  { %39 = vsyncadd [#allocation0], 4294966784 }
   0x6   :  { %13 = vsyncpa [#allocation0], 1 }

// kernel: custom-call
= control target key start
LH: loop header
LB: loop body
LE: loop exit
PB: predicated region body
PF: predicated region fallthrough
CT: control target
= control target key end

     0   :  { %2 = vsyncpa [#allocation0], 0  ;;  %s55_s0 = inlined_call_operand.hbm [shape: c64[1,2,16,16], index: 0, kind: input, shape index: {}]   ;;  %s56_s1 = inlined_call_operand.vmem [shape: f32[1,2,16,16], index: 1, kind: output, shape index: {}]  }
   0x1   :  { %s4_s8 = sshll.u32 %s55_s0, 4  ;;  %s6_s11 = sshll.u32 %s56_s1, 4  ;;  %s5_s8 = int_to_ptr.hbm [resolvable:$true] %s4_s8  ;;  %s7_s11 = int_to_ptr.vmem [resolvable:$true] %s6_s11 }
   0x2   :  { %9 = dma.hbm_to_vmem [thread:$0]  %s5_s8, 512, %s7_s11, [#allocation0] }
   0x3   :  { %37 = dma.done.wait [#allocation0], 512  }
   0x4   :  { %38 = vsyncadd [#allocation0], 4294966784 }
   0x5   :  { %12 = vsyncpa [#allocation0], 1 }

// kernel: custom-call.2
= control target key start
LH: loop header
LB: loop body
LE: loop exit
PB: predicated region body
PF: predicated region fallthrough
CT: control target
= control target key end

     0   :  { %s105_s0 = inlined_call_operand.vmem [shape: f32[1,2,16,16], index: 0, kind: input, shape index: {}]   ;;  %s106_s1 = inlined_call_operand.vmem [shape: f32[1,2,16,16], index: 1, kind: input, shape index: {}]   ;;  %s107_s2 = inlined_call_operand.hbm [shape: c64[1,2,16,16], index: 2, kind: output, shape index: {}]  }
   0x1   :  { %s3_s11 = scalar_lea.hbm %s107_s2, 32 }
   0x2   :  { %4 = vsyncpa [#allocation0], 0  ;;  %s6_s14 = sshll.u32 %s105_s0, 4  ;;  %s8_s17 = sshll.u32 %s107_s2, 4  ;;  %s7_s14 = int_to_ptr.vmem [resolvable:$true] %s6_s14  ;;  %s9_s17 = int_to_ptr.hbm [resolvable:$true] %s8_s17 }
   0x3   :  { %11 = dma.vmem_to_hbm [thread:$0]  %s7_s14, 512, %s9_s17, [#allocation0] }
   0x4   :  { %74 = dma.done.wait [#allocation0], 512  }
   0x5   :  { %75 = vsyncadd [#allocation0], 4294966784 }
   0x6   :  { %14 = vsyncpa [#allocation0], 1 }
   0x7   :  { %15 = vsyncpa [#allocation1], 0  ;;  %s17_s20 = sshll.u32 %s106_s1, 4  ;;  %s19_s21 = sshll.u32 %s3_s11, 4  ;;  %s18_s20 = int_to_ptr.vmem [resolvable:$true] %s17_s20  ;;  %s20_s21 = int_to_ptr.hbm [resolvable:$true] %s19_s21 }
   0x8   :  { %22 = dma.vmem_to_hbm [thread:$0]  %s18_s20, 512, %s20_s21, [#allocation1] }
   0x9   :  { %76 = dma.done.wait [#allocation1], 512  }
   0xa   :  { %77 = vsyncadd [#allocation1], 4294966784 }
   0xb   :  { %25 = vsyncpa [#allocation1], 1 }

// kernel: denoiser_forward.1
= control target key start
LH: loop header
LB: loop body
LE: loop exit
PB: predicated region body
PF: predicated region fallthrough
CT: control target
= control target key end

     0   :  { %s2742_s0 = inlined_call_operand.<no memory space> [shape: f32[1], index: 0, kind: input, shape index: {}]   ;;  %s2743_s1 = inlined_call_operand.vmem [shape: f32[864], index: 1, kind: input, shape index: {}]   ;;  %s2744_s2 = inlined_call_operand.vmem [shape: f32[32], index: 2, kind: input, shape index: {}]   ;;  %s2745_s3 = inlined_call_operand.vmem [shape: f32[288], index: 3, kind: input, shape index: {}]   ;;  %s2746_s4 = inlined_call_operand.vmem [shape: f32[288], index: 4, kind: input, shape index: {}]   ;;  %s2747_s5 = inlined_call_operand.vmem [shape: f32[2], index: 5, kind: input, shape index: {}]   ;;  %s2748_s6 = inlined_call_operand.vmem [shape: f32[2,2,16,16], index: 6, kind: input, shape index: {}]   ;;  %s2749_s7 = inlined_call_operand.vmem [shape: f32[2,16,32], index: 7, kind: output, shape index: {}]  }
   0x1   :  { %12 = sst [smem:[#allocation4]] %s2742_s0 }
   0x2   :  { %13 = vsyncpa [#allocation6], 0 }
   0x3   :  { %14 = vsyncpa [#allocation8], 0 }
   0x4   :  { %15 = vsyncpa [#allocation11], 0  ;;  %s1767_s26 = smov 0  }
   0x5 LB: > { %s229_s29 = sshll.u32 %s2744_s2, 4  ;;  %s1776_s30 = sadd.s32 4294967295, %s1685_s26   ;;  %s1685_s26 = sphi %s1767_s26, %s21_s26   ;;  %s230_s29 = int_to_ptr.vmem [resolvable:$true] %s229_s29 }
   0x6   : > { %p1431_p0 = scmp.ge.s32.totalorder %s1685_s26, 1  ;;  %p204_p1 = scmp.lt.s32.totalorder %s1685_s26, 3 }
   0x7   : > { %p1489_p2 = scmp.eq.s32.totalorder %s1776_s30, 0  ;;  %s249_s10 = sshll.u32 %s2746_s4, 4  ;;  %s250_s10 = int_to_ptr.vmem [resolvable:$true] %s249_s10 }
   0x8   : > { %p1781_p3 = pnand %p1431_p0, %p204_p1  ;;  %s219_s13 = sshll.u32 %s2743_s1, 4  ;;  %s220_s13 = int_to_ptr.vmem [resolvable:$true] %s219_s13 }
   0x9   : > { %s239_s17 = sshll.u32 %s2745_s3, 4  ;;  %s259_s20 = sshll.u32 %s2747_s5, 4  ;;  %s240_s17 = int_to_ptr.vmem [resolvable:$true] %s239_s17  ;;  %s260_s20 = int_to_ptr.vmem [resolvable:$true] %s259_s20 }
   0xa   : > { %p1473_p4 = pneg %p1781_p3  ;;  %s1711_s21 = smov [#allocation7]  }
   0xb   : > { %s1712_s22 = smov [#allocation10]   ;;  %s1713_s23 = smov [#allocation5]  }
   0xc   : > { %p1795_p5 = pnand %p1489_p2, %p1473_p4  ;;  %s1714_s24 = smov [#allocation9]  }
   0xd   : > { %s1715_s25 = smov [#allocation12]  }
   0xe   : > { %1479 = dma.vmem_to_smem (!%p1795_p5), %s230_s29, 16, %s1711_s21, [#allocation8]  }
   0xf   : > { %1485 = dma.vmem_to_smem (!%p1795_p5), %s250_s10, 48, %s1712_s22, [#allocation11]  }
  0x10   : > { %1476 = dma.vmem_to_smem (!%p1795_p5), %s220_s13, 112, %s1713_s23, [#allocation6]  }
  0x11   : > { %1482 = dma.vmem_to_smem (!%p1795_p5), %s240_s17, 48, %s1714_s24, [#allocation8]  }
  0x12   : > { %1488 = dma.vmem_to_smem (!%p1795_p5), %s260_s20, 16, %s1715_s25, [#allocation11]  }
  0x13   : > { %280 = sbr.rel (%p1781_p3) target bundleno = 983 (0x3d7), region = 48 }
  0x18   : > { %1672 = dma.done.wait (%p1489_p2), [#allocation6], 112  }
  0x19   : > { %1674 = vsyncadd (%p1489_p2), [#allocation6], 4294967184 }
  0x1a   : > { %1676 = dma.done.wait (%p1489_p2), [#allocation8], 64  }
  0x1b   : > { %1678 = vsyncadd (%p1489_p2), [#allocation8], 4294967232 }
  0x1c   : > { %1680 = dma.done.wait (%p1489_p2), [#allocation11], 64  }
  0x1d   : > { %1682 = vsyncadd (%p1489_p2), [#allocation11], 4294967232 }
  0x1e   : > { %307 = sfence }
  0x1f   : > { %p334_p6 = scmp.lt.s32.totalorder %s1776_s30, 1  ;;  %vm345_vm0 = vcmask 139264   ;;  %v1716_v0 = vmov 0.0   ;;  %vm352_vm1 = vcmask 7168   ;;  %vm355_vm2 = vcmask 1024   ;;  %s344_s12 = sld [smem:[#allocation4]] }
  0x20   : > { %347 = vst.msk [vmem:[#allocation2 + $0x18] sm:$0x1] %vm345_vm0, %v1716_v0  ;;  %vm363_vm3 = vcmask 146568   ;;  %vm366_vm4 = vcmask 140424   ;;  %vm646_vm5 = vcmask 138248   ;;  %s2453_s13 = smov 0  }
  0x21   : > { %s2757_s30 = smov (!%p334_p6, %s1776_s30), 1  ;;  %348 = vst.msk [vmem:[#allocation2 + $0x30] sm:$0x1] %vm345_vm0, %v1716_v0 }
  0x22   : > { %351 = vst.msk [vmem:[#allocation2 + $0x41] sm:$0x1] %vm345_vm0, %v1716_v0  ;;  %s1451_s27 = sshll.u32 %s2757_s30, 5  ;;  %s1452_s28 = sshll.u32 %s2757_s30, 4 }
  0x23   : > { %357 = vst.msk [vmem:[#allocation2 + $0x18] sm:$0xff] %vm352_vm1, %v1716_v0  ;;  %s338_s8 = scalar_lea.vmem %s2748_s6, %s1451_s27  ;;  %s1845_s11 = scalar_lea.vmem %s2749_s7, %s1452_s28 }
  0x24   : > { %358 = vst.msk [vmem:[#allocation2 + $0x20] sm:$0xff] %vm352_vm1, %v1716_v0  ;;  %v632_v1 = vld [vmem:[%s338_s8 + $0x10] sm:$0xff]  ;;  %v630_v2 = vld [vmem:[%s338_s8] sm:$0xff]  ;;  %s1717_s30 = smov 1   ;;  %v633_v5 = vld [vmem:[%s338_s8 + $0x18] sm:$0xff] }
  0x25   : > { %360 = vst.msk [vmem:[#allocation2 + $0x30] sm:$0xff] %vm352_vm1, %v1716_v0  ;;  %v1851_v3 = vmul.f32 10000.0, %v632_v1  ;;  %v1853_v4 = vmul.f32 10000.0, %v630_v2  ;;  %v631_v6 = vld [vmem:[%s338_s8 + $0x8] sm:$0xff]  ;;  %v1869_v7 = vmul.f32 10000.0, %v633_v5  ;;  %v660_v9 = vstv %s344_s12 }
  0x26   : > { %361 = vst.msk [vmem:[#allocation2 + $0x38] sm:$0xff] %vm352_vm1, %v1716_v0  ;;  %v1871_v8 = vmul.f32 10000.0, %v631_v6 }
  0x27   : > { %362 = vst.msk [vmem:[#allocation2 + $0x40] sm:$0x3] %vm355_vm2, %v1716_v0  ;;  %651 = vrot.lane.b32.xlu1 %v1851_v3, %s1717_s30  ;;  %640 = vrot.lane.b32.xlu0 %v1853_v4, %s1717_s30 }
  0x28   : > { %368 = vst.msk [vmem:[#allocation2 + $0x18] sm:$0xff] %vm363_vm3, %v1716_v0 }
  0x29   : > { %369 = vst.msk [vmem:[#allocation2 + $0x20] sm:$0xff] %vm363_vm3, %v1716_v0 }
  0x2a   : > { %371 = vst.msk [vmem:[#allocation2 + $0x30] sm:$0xff] %vm363_vm3, %v1716_v0 }
  0x2b   : > { %372 = vst.msk [vmem:[#allocation2 + $0x38] sm:$0xff] %vm363_vm3, %v1716_v0 }
  0x2c   : > { %373 = vst.msk [vmem:[#allocation2 + $0x40] sm:$0x3] %vm366_vm4, %v1716_v0 }
  0x2d   : > { %374 = vst.msk [vmem:[#allocation3] sm:$0x1] %vm345_vm0, %v1716_v0 }
  0x2e   : > { %375 = vst.msk [vmem:[#allocation3 + $0x18] sm:$0x1] %vm345_vm0, %v1716_v0 }
  0x2f   : > { %376 = vst.msk [vmem:[#allocation3 + $0x30] sm:$0x1] %vm345_vm0, %v1716_v0  ;;  %653 = vrot.lane.b32.xlu1 %v1869_v7, %s1717_s30  ;;  %642 = vrot.lane.b32.xlu0 %v1871_v8, %s1717_s30 }
  0x30   : > { %377 = vst.msk [vmem:[#allocation3 + $0x48] sm:$0x1] %vm345_vm0, %v1716_v0 }
  0x31   : > { %378 = vst.msk [vmem:[#allocation3 + $0x60] sm:$0x1] %vm345_vm0, %v1716_v0 }
  0x32   : > { %379 = vst.msk [vmem:[#allocation3 + $0x78] sm:$0x1] %vm345_vm0, %v1716_v0 }
  0x33   : > { %380 = vst.msk [vmem:[#allocation3 + $0x90] sm:$0x1] %vm345_vm0, %v1716_v0 }
  0x34   : > { %381 = vst.msk [vmem:[#allocation3 + $0xa8] sm:$0x1] %vm345_vm0, %v1716_v0 }
  0x35   : > { %382 = vst.msk [vmem:[#allocation3 + $0xc0] sm:$0x1] %vm345_vm0, %v1716_v0 }
  0x36   : > { %383 = vst.msk [vmem:[#allocation3 + $0xd8] sm:$0x1] %vm345_vm0, %v1716_v0 }
  0x37   : > { %384 = vst.msk [vmem:[#allocation3 + $0xf0] sm:$0x1] %vm345_vm0, %v1716_v0 }
  0x38   : > { %385 = vst.msk [vmem:[#allocation3 + $0x108] sm:$0x1] %vm345_vm0, %v1716_v0 }
  0x39   : > { %386 = vst.msk [vmem:[#allocation3 + $0x120] sm:$0x1] %vm345_vm0, %v1716_v0 }
  0x3a   : > { %387 = vst.msk [vmem:[#allocation3 + $0x138] sm:$0x1] %vm345_vm0, %v1716_v0 }
  0x3b   : > { %388 = vst.msk [vmem:[#allocation3 + $0x150] sm:$0x1] %vm345_vm0, %v1716_v0 }
  0x3c   : > { %389 = vst.msk [vmem:[#allocation3 + $0x168] sm:$0x1] %vm345_vm0, %v1716_v0 }
  0x3d   : > { %390 = vst.msk [vmem:[#allocation3 + $0x180] sm:$0x1] %vm345_vm0, %v1716_v0 }
  0x3e   : > { %391 = vst.msk [vmem:[#allocation3 + $0x198] sm:$0x1] %vm345_vm0, %v1716_v0 }
  0x3f   : > { %392 = vst.msk [vmem:[#allocation3 + $0x1b0] sm:$0x1] %vm345_vm0, %v1716_v0 }
  0x40   : > { %393 = vst.msk [vmem:[#allocation3 + $0x1c8] sm:$0x1] %vm345_vm0, %v1716_v0 }
  0x41   : > { %394 = vst.msk [vmem:[#allocation3 + $0x1e0] sm:$0x1] %vm345_vm0, %v1716_v0 }
  0x42   : > { %395 = vst.msk [vmem:[#allocation3 + $0x1f8] sm:$0x1] %vm345_vm0, %v1716_v0 }
  0x43   : > { %396 = vst.msk [vmem:[#allocation3 + $0x210] sm:$0x1] %vm345_vm0, %v1716_v0 }
  0x44   : > { %397 = vst.msk [vmem:[#allocation3 + $0x228] sm:$0x1] %vm345_vm0, %v1716_v0 }
  0x45   : > { %398 = vst.msk [vmem:[#allocation3 + $0x240] sm:$0x1] %vm345_vm0, %v1716_v0 }
  0x46   : > { %399 = vst.msk [vmem:[#allocation3 + $0x258] sm:$0x1] %vm345_vm0, %v1716_v0 }
  0x47   : > { %400 = vst.msk [vmem:[#allocation3 + $0x270] sm:$0x1] %vm345_vm0, %v1716_v0 }
  0x48   : > { %401 = vst.msk [vmem:[#allocation3 + $0x288] sm:$0x1] %vm345_vm0, %v1716_v0 }
  0x49   : > { %402 = vst.msk [vmem:[#allocation3 + $0x2a0] sm:$0x1] %vm345_vm0, %v1716_v0 }
  0x4a   : > { %403 = vst.msk [vmem:[#allocation3 + $0x2b8] sm:$0x1] %vm345_vm0, %v1716_v0 }
  0x4b   : > { %404 = vst.msk [vmem:[#allocation3 + $0x2d0] sm:$0x1] %vm345_vm0, %v1716_v0 }
  0x4c   : > { %405 = vst.msk [vmem:[#allocation3 + $0x2e8] sm:$0x1] %vm345_vm0, %v1716_v0 }
  0x4d   : > { %406 = vst.msk [vmem:[#allocation3 + $0x11] sm:$0x1] %vm345_vm0, %v1716_v0 }
  0x4e   : > { %407 = vst.msk [vmem:[#allocation3 + $0x29] sm:$0x1] %vm345_vm0, %v1716_v0 }
  0x4f   : > { %408 = vst.msk [vmem:[#allocation3 + $0x41] sm:$0x1] %vm345_vm0, %v1716_v0 }
  0x50   : > { %409 = vst.msk [vmem:[#allocation3 + $0x59] sm:$0x1] %vm345_vm0, %v1716_v0 }
  0x51   : > { %410 = vst.msk [vmem:[#allocation3 + $0x71] sm:$0x1] %vm345_vm0, %v1716_v0 }
  0x52   : > { %411 = vst.msk [vmem:[#allocation3 + $0x89] sm:$0x1] %vm345_vm0, %v1716_v0 }
  0x53   : > { %412 = vst.msk [vmem:[#allocation3 + $0xa1] sm:$0x1] %vm345_vm0, %v1716_v0 }
  0x54   : > { %413 = vst.msk [vmem:[#allocation3 + $0xb9] sm:$0x1] %vm345_vm0, %v1716_v0 }
  0x55   : > { %414 = vst.msk [vmem:[#allocation3 + $0xd1] sm:$0x1] %vm345_vm0, %v1716_v0 }
  0x56   : > { %415 = vst.msk [vmem:[#allocation3 + $0xe9] sm:$0x1] %vm345_vm0, %v1716_v0 }
  0x57   : > { %416 = vst.msk [vmem:[#allocation3 + $0x101] sm:$0x1] %vm345_vm0, %v1716_v0 }
  0x58   : > { %417 = vst.msk [vmem:[#allocation3 + $0x119] sm:$0x1] %vm345_vm0, %v1716_v0 }
  0x59   : > { %418 = vst.msk [vmem:[#allocation3 + $0x131] sm:$0x1] %vm345_vm0, %v1716_v0 }
  0x5a   : > { %419 = vst.msk [vmem:[#allocation3 + $0x149] sm:$0x1] %vm345_vm0, %v1716_v0 }
  0x5b   : > { %420 = vst.msk [vmem:[#allocation3 + $0x161] sm:$0x1] %vm345_vm0, %v1716_v0 }
  0x5c   : > { %421 = vst.msk [vmem:[#allocation3 + $0x179] sm:$0x1] %vm345_vm0, %v1716_v0 }
  0x5d   : > { %422 = vst.msk [vmem:[#allocation3 + $0x191] sm:$0x1] %vm345_vm0, %v1716_v0 }
  0x5e   : > { %423 = vst.msk [vmem:[#allocation3 + $0x1a9] sm:$0x1] %vm345_vm0, %v1716_v0 }
  0x5f   : > { %424 = vst.msk [vmem:[#allocation3 + $0x1c1] sm:$0x1] %vm345_vm0, %v1716_v0 }
  0x60   : > { %425 = vst.msk [vmem:[#allocation3 + $0x1d9] sm:$0x1] %vm345_vm0, %v1716_v0 }
  0x61   : > { %426 = vst.msk [vmem:[#allocation3 + $0x1f1] sm:$0x1] %vm345_vm0, %v1716_v0 }
  0x62   : > { %427 = vst.msk [vmem:[#allocation3 + $0x209] sm:$0x1] %vm345_vm0, %v1716_v0 }
  0x63   : > { %428 = vst.msk [vmem:[#allocation3 + $0x221] sm:$0x1] %vm345_vm0, %v1716_v0 }
  0x64   : > { %429 = vst.msk [vmem:[#allocation3 + $0x239] sm:$0x1] %vm345_vm0, %v1716_v0 }
  0x65   : > { %430 = vst.msk [vmem:[#allocation3 + $0x251] sm:$0x1] %vm345_vm0, %v1716_v0 }
  0x66   : > { %431 = vst.msk [vmem:[#allocation3 + $0x269] sm:$0x1] %vm345_vm0, %v1716_v0 }
  0x67   : > { %432 = vst.msk [vmem:[#allocation3 + $0x281] sm:$0x1] %vm345_vm0, %v1716_v0 }
  0x68   : > { %433 = vst.msk [vmem:[#allocation3 + $0x299] sm:$0x1] %vm345_vm0, %v1716_v0 }
  0x69   : > { %434 = vst.msk [vmem:[#allocation3 + $0x2b1] sm:$0x1] %vm345_vm0, %v1716_v0 }
  0x6a   : > { %435 = vst.msk [vmem:[#allocation3 + $0x2c9] sm:$0x1] %vm345_vm0, %v1716_v0 }
  0x6b   : > { %436 = vst.msk [vmem:[#allocation3 + $0x2e1] sm:$0x1] %vm345_vm0, %v1716_v0 }
  0x6c   : > { %437 = vst.msk [vmem:[#allocation3 + $0x2f9] sm:$0x1] %vm345_vm0, %v1716_v0 }
  0x6d   : > { %438 = vst.msk [vmem:[#allocation3] sm:$0xff] %vm352_vm1, %v1716_v0 }
  0x6e   : > { %439 = vst.msk [vmem:[#allocation3 + $0x8] sm:$0xff] %vm352_vm1, %v1716_v0 }
  0x6f   : > { %440 = vst.msk [vmem:[#allocation3 + $0x10] sm:$0x3] %vm355_vm2, %v1716_v0 }
  0x70   : > { %441 = vst.msk [vmem:[#allocation3 + $0x18] sm:$0xff] %vm352_vm1, %v1716_v0 }
  0x71   : > { %442 = vst.msk [vmem:[#allocation3 + $0x20] sm:$0xff] %vm352_vm1, %v1716_v0 }
  0x72   : > { %443 = vst.msk [vmem:[#allocation3 + $0x28] sm:$0x3] %vm355_vm2, %v1716_v0 }
  0x73   : > { %444 = vst.msk [vmem:[#allocation3 + $0x30] sm:$0xff] %vm352_vm1, %v1716_v0 }
  0x74   : > { %445 = vst.msk [vmem:[#allocation3 + $0x38] sm:$0xff] %vm352_vm1, %v1716_v0 }
  0x75   : > { %446 = vst.msk [vmem:[#allocation3 + $0x40] sm:$0x3] %vm355_vm2, %v1716_v0 }
  0x76   : > { %447 = vst.msk [vmem:[#allocation3 + $0x48] sm:$0xff] %vm352_vm1, %v1716_v0 }
  0x77   : > { %448 = vst.msk [vmem:[#allocation3 + $0x50] sm:$0xff] %vm352_vm1, %v1716_v0 }
  0x78   : > { %449 = vst.msk [vmem:[#allocation3 + $0x58] sm:$0x3] %vm355_vm2, %v1716_v0 }
  0x79   : > { %450 = vst.msk [vmem:[#allocation3 + $0x60] sm:$0xff] %vm352_vm1, %v1716_v0 }
  0x7a   : > { %451 = vst.msk [vmem:[#allocation3 + $0x68] sm:$0xff] %vm352_vm1, %v1716_v0 }
  0x7b   : > { %452 = vst.msk [vmem:[#allocation3 + $0x70] sm:$0x3] %vm355_vm2, %v1716_v0 }
  0x7c   : > { %453 = vst.msk [vmem:[#allocation3 + $0x78] sm:$0xff] %vm352_vm1, %v1716_v0 }
  0x7d   : > { %454 = vst.msk [vmem:[#allocation3 + $0x80] sm:$0xff] %vm352_vm1, %v1716_v0 }
  0x7e   : > { %455 = vst.msk [vmem:[#allocation3 + $0x88] sm:$0x3] %vm355_vm2, %v1716_v0 }
  0x7f   : > { %456 = vst.msk [vmem:[#allocation3 + $0x90] sm:$0xff] %vm352_vm1, %v1716_v0 }
  0x80   : > { %457 = vst.msk [vmem:[#allocation3 + $0x98] sm:$0xff] %vm352_vm1, %v1716_v0 }
  0x81   : > { %458 = vst.msk [vmem:[#allocation3 + $0xa0] sm:$0x3] %vm355_vm2, %v1716_v0 }
  0x82   : > { %459 = vst.msk [vmem:[#allocation3 + $0xa8] sm:$0xff] %vm352_vm1, %v1716_v0 }
  0x83   : > { %460 = vst.msk [vmem:[#allocation3 + $0xb0] sm:$0xff] %vm352_vm1, %v1716_v0 }
  0x84   : > { %461 = vst.msk [vmem:[#allocation3 + $0xb8] sm:$0x3] %vm355_vm2, %v1716_v0 }
  0x85   : > { %462 = vst.msk [vmem:[#allocation3 + $0xc0] sm:$0xff] %vm352_vm1, %v1716_v0 }
  0x86   : > { %463 = vst.msk [vmem:[#allocation3 + $0xc8] sm:$0xff] %vm352_vm1, %v1716_v0 }
  0x87   : > { %464 = vst.msk [vmem:[#allocation3 + $0xd0] sm:$0x3] %vm355_vm2, %v1716_v0 }
  0x88   : > { %465 = vst.msk [vmem:[#allocation3 + $0xd8] sm:$0xff] %vm352_vm1, %v1716_v0 }
  0x89   : > { %466 = vst.msk [vmem:[#allocation3 + $0xe0] sm:$0xff] %vm352_vm1, %v1716_v0 }
  0x8a   : > { %467 = vst.msk [vmem:[#allocation3 + $0xe8] sm:$0x3] %vm355_vm2, %v1716_v0 }
  0x8b   : > { %468 = vst.msk [vmem:[#allocation3 + $0xf0] sm:$0xff] %vm352_vm1, %v1716_v0 }
  0x8c   : > { %469 = vst.msk [vmem:[#allocation3 + $0xf8] sm:$0xff] %vm352_vm1, %v1716_v0 }
  0x8d   : > { %470 = vst.msk [vmem:[#allocation3 + $0x100] sm:$0x3] %vm355_vm2, %v1716_v0 }
  0x8e   : > { %471 = vst.msk [vmem:[#allocation3 + $0x108] sm:$0xff] %vm352_vm1, %v1716_v0 }
  0x8f   : > { %472 = vst.msk [vmem:[#allocation3 + $0x110] sm:$0xff] %vm352_vm1, %v1716_v0 }
  0x90   : > { %473 = vst.msk [vmem:[#allocation3 + $0x118] sm:$0x3] %vm355_vm2, %v1716_v0 }
  0x91   : > { %474 = vst.msk [vmem:[#allocation3 + $0x120] sm:$0xff] %vm352_vm1, %v1716_v0 }
  0x92   : > { %475 = vst.msk [vmem:[#allocation3 + $0x128] sm:$0xff] %vm352_vm1, %v1716_v0 }
  0x93   : > { %476 = vst.msk [vmem:[#allocation3 + $0x130] sm:$0x3] %vm355_vm2, %v1716_v0 }
  0x94   : > { %477 = vst.msk [vmem:[#allocation3 + $0x138] sm:$0xff] %vm352_vm1, %v1716_v0 }
  0x95   : > { %478 = vst.msk [vmem:[#allocation3 + $0x140] sm:$0xff] %vm352_vm1, %v1716_v0 }
  0x96   : > { %479 = vst.msk [vmem:[#allocation3 + $0x148] sm:$0x3] %vm355_vm2, %v1716_v0 }
  0x97   : > { %480 = vst.msk [vmem:[#allocation3 + $0x150] sm:$0xff] %vm352_vm1, %v1716_v0 }
  0x98   : > { %481 = vst.msk [vmem:[#allocation3 + $0x158] sm:$0xff] %vm352_vm1, %v1716_v0 }
  0x99   : > { %482 = vst.msk [vmem:[#allocation3 + $0x160] sm:$0x3] %vm355_vm2, %v1716_v0  ;;  %v652_v10 = vpop.permute.xlu1 %651  ;;  %v641_v11 = vpop.permute.xlu0 %640 }
  0x9a   : > { %483 = vst.msk [vmem:[#allocation3 + $0x168] sm:$0xff] %vm352_vm1, %v1716_v0 }
  0x9b   : > { %484 = vst.msk [vmem:[#allocation3 + $0x170] sm:$0xff] %vm352_vm1, %v1716_v0 }
  0x9c   : > { %485 = vst.msk [vmem:[#allocation3 + $0x178] sm:$0x3] %vm355_vm2, %v1716_v0 }
  0x9d   : > { %486 = vst.msk [vmem:[#allocation3 + $0x180] sm:$0xff] %vm352_vm1, %v1716_v0 }
  0x9e   : > { %487 = vst.msk [vmem:[#allocation3 + $0x188] sm:$0xff] %vm352_vm1, %v1716_v0 }
  0x9f   : > { %488 = vst.msk [vmem:[#allocation3 + $0x190] sm:$0x3] %vm355_vm2, %v1716_v0 }
  0xa0   : > { %489 = vst.msk [vmem:[#allocation3 + $0x198] sm:$0xff] %vm352_vm1, %v1716_v0 }
  0xa1   : > { %490 = vst.msk [vmem:[#allocation3 + $0x1a0] sm:$0xff] %vm352_vm1, %v1716_v0  ;;  %v654_v20 = vpop.permute.xlu1 %653  ;;  %v643_v21 = vpop.permute.xlu0 %642 }
  0xa2   : > { %491 = vst.msk [vmem:[#allocation3 + $0x1a8] sm:$0x3] %vm355_vm2, %v1716_v0 }
  0xa3   : > { %492 = vst.msk [vmem:[#allocation3 + $0x1b0] sm:$0xff] %vm352_vm1, %v1716_v0 }
  0xa4   : > { %493 = vst.msk [vmem:[#allocation3 + $0x1b8] sm:$0xff] %vm352_vm1, %v1716_v0 }
  0xa5   : > { %494 = vst.msk [vmem:[#allocation3 + $0x1c0] sm:$0x3] %vm355_vm2, %v1716_v0 }
  0xa6   : > { %495 = vst.msk [vmem:[#allocation3 + $0x1c8] sm:$0xff] %vm352_vm1, %v1716_v0 }
  0xa7   : > { %496 = vst.msk [vmem:[#allocation3 + $0x1d0] sm:$0xff] %vm352_vm1, %v1716_v0 }
  0xa8   : > { %497 = vst.msk [vmem:[#allocation3 + $0x1d8] sm:$0x3] %vm355_vm2, %v1716_v0 }
  0xa9   : > { %498 = vst.msk [vmem:[#allocation3 + $0x1e0] sm:$0xff] %vm352_vm1, %v1716_v0 }
  0xaa   : > { %499 = vst.msk [vmem:[#allocation3 + $0x1e8] sm:$0xff] %vm352_vm1, %v1716_v0 }
  0xab   : > { %500 = vst.msk [vmem:[#allocation3 + $0x1f0] sm:$0x3] %vm355_vm2, %v1716_v0 }
  0xac   : > { %501 = vst.msk [vmem:[#allocation3 + $0x1f8] sm:$0xff] %vm352_vm1, %v1716_v0 }
  0xad   : > { %502 = vst.msk [vmem:[#allocation3 + $0x200] sm:$0xff] %vm352_vm1, %v1716_v0 }
  0xae   : > { %503 = vst.msk [vmem:[#allocation3 + $0x208] sm:$0x3] %vm355_vm2, %v1716_v0 }
  0xaf   : > { %504 = vst.msk [vmem:[#allocation3 + $0x210] sm:$0xff] %vm352_vm1, %v1716_v0 }
  0xb0   : > { %505 = vst.msk [vmem:[#allocation3 + $0x218] sm:$0xff] %vm352_vm1, %v1716_v0 }
  0xb1   : > { %506 = vst.msk [vmem:[#allocation3 + $0x220] sm:$0x3] %vm355_vm2, %v1716_v0 }
  0xb2   : > { %507 = vst.msk [vmem:[#allocation3 + $0x228] sm:$0xff] %vm352_vm1, %v1716_v0 }
  0xb3   : > { %508 = vst.msk [vmem:[#allocation3 + $0x230] sm:$0xff] %vm352_vm1, %v1716_v0 }
  0xb4   : > { %509 = vst.msk [vmem:[#allocation3 + $0x238] sm:$0x3] %vm355_vm2, %v1716_v0 }
  0xb5   : > { %510 = vst.msk [vmem:[#allocation3 + $0x240] sm:$0xff] %vm352_vm1, %v1716_v0 }
  0xb6   : > { %511 = vst.msk [vmem:[#allocation3 + $0x248] sm:$0xff] %vm352_vm1, %v1716_v0 }
  0xb7   : > { %512 = vst.msk [vmem:[#allocation3 + $0x250] sm:$0x3] %vm355_vm2, %v1716_v0 }
  0xb8   : > { %513 = vst.msk [vmem:[#allocation3 + $0x258] sm:$0xff] %vm352_vm1, %v1716_v0 }
  0xb9   : > { %514 = vst.msk [vmem:[#allocation3 + $0x260] sm:$0xff] %vm352_vm1, %v1716_v0 }
  0xba   : > { %515 = vst.msk [vmem:[#allocation3 + $0x268] sm:$0x3] %vm355_vm2, %v1716_v0 }
  0xbb   : > { %516 = vst.msk [vmem:[#allocation3 + $0x270] sm:$0xff] %vm352_vm1, %v1716_v0 }
  0xbc   : > { %517 = vst.msk [vmem:[#allocation3 + $0x278] sm:$0xff] %vm352_vm1, %v1716_v0 }
  0xbd   : > { %518 = vst.msk [vmem:[#allocation3 + $0x280] sm:$0x3] %vm355_vm2, %v1716_v0 }
  0xbe   : > { %519 = vst.msk [vmem:[#allocation3 + $0x288] sm:$0xff] %vm352_vm1, %v1716_v0 }
  0xbf   : > { %520 = vst.msk [vmem:[#allocation3 + $0x290] sm:$0xff] %vm352_vm1, %v1716_v0 }
  0xc0   : > { %521 = vst.msk [vmem:[#allocation3 + $0x298] sm:$0x3] %vm355_vm2, %v1716_v0 }
  0xc1   : > { %522 = vst.msk [vmem:[#allocation3 + $0x2a0] sm:$0xff] %vm352_vm1, %v1716_v0 }
  0xc2   : > { %523 = vst.msk [vmem:[#allocation3 + $0x2a8] sm:$0xff] %vm352_vm1, %v1716_v0 }
  0xc3   : > { %524 = vst.msk [vmem:[#allocation3 + $0x2b0] sm:$0x3] %vm355_vm2, %v1716_v0 }
  0xc4   : > { %525 = vst.msk [vmem:[#allocation3 + $0x2b8] sm:$0xff] %vm352_vm1, %v1716_v0 }
  0xc5   : > { %526 = vst.msk [vmem:[#allocation3 + $0x2c0] sm:$0xff] %vm352_vm1, %v1716_v0 }
  0xc6   : > { %527 = vst.msk [vmem:[#allocation3 + $0x2c8] sm:$0x3] %vm355_vm2, %v1716_v0 }
  0xc7   : > { %528 = vst.msk [vmem:[#allocation3 + $0x2d0] sm:$0xff] %vm352_vm1, %v1716_v0 }
  0xc8   : > { %529 = vst.msk [vmem:[#allocation3 + $0x2d8] sm:$0xff] %vm352_vm1, %v1716_v0 }
  0xc9   : > { %530 = vst.msk [vmem:[#allocation3 + $0x2e0] sm:$0x3] %vm355_vm2, %v1716_v0 }
  0xca   : > { %531 = vst.msk [vmem:[#allocation3 + $0x2e8] sm:$0xff] %vm352_vm1, %v1716_v0 }
  0xcb   : > { %532 = vst.msk [vmem:[#allocation3 + $0x2f0] sm:$0xff] %vm352_vm1, %v1716_v0 }
  0xcc   : > { %533 = vst.msk [vmem:[#allocation3 + $0x2f8] sm:$0x3] %vm355_vm2, %v1716_v0 }
  0xcd   : > { %534 = vst.msk [vmem:[#allocation3] sm:$0xff] %vm363_vm3, %v1716_v0 }
  0xce   : > { %535 = vst.msk [vmem:[#allocation3 + $0x8] sm:$0xff] %vm363_vm3, %v1716_v0 }
  0xcf   : > { %536 = vst.msk [vmem:[#allocation3 + $0x10] sm:$0x3] %vm366_vm4, %v1716_v0 }
  0xd0   : > { %537 = vst.msk [vmem:[#allocation3 + $0x18] sm:$0xff] %vm363_vm3, %v1716_v0 }
  0xd1   : > { %538 = vst.msk [vmem:[#allocation3 + $0x20] sm:$0xff] %vm363_vm3, %v1716_v0 }
  0xd2   : > { %539 = vst.msk [vmem:[#allocation3 + $0x28] sm:$0x3] %vm366_vm4, %v1716_v0 }
  0xd3   : > { %540 = vst.msk [vmem:[#allocation3 + $0x30] sm:$0xff] %vm363_vm3, %v1716_v0 }
  0xd4   : > { %541 = vst.msk [vmem:[#allocation3 + $0x38] sm:$0xff] %vm363_vm3, %v1716_v0 }
  0xd5   : > { %542 = vst.msk [vmem:[#allocation3 + $0x40] sm:$0x3] %vm366_vm4, %v1716_v0 }
  0xd6   : > { %543 = vst.msk [vmem:[#allocation3 + $0x48] sm:$0xff] %vm363_vm3, %v1716_v0 }
  0xd7   : > { %544 = vst.msk [vmem:[#allocation3 + $0x50] sm:$0xff] %vm363_vm3, %v1716_v0 }
  0xd8   : > { %545 = vst.msk [vmem:[#allocation3 + $0x58] sm:$0x3] %vm366_vm4, %v1716_v0 }
  0xd9   : > { %546 = vst.msk [vmem:[#allocation3 + $0x60] sm:$0xff] %vm363_vm3, %v1716_v0 }
  0xda   : > { %547 = vst.msk [vmem:[#allocation3 + $0x68] sm:$0xff] %vm363_vm3, %v1716_v0 }
  0xdb   : > { %548 = vst.msk [vmem:[#allocation3 + $0x70] sm:$0x3] %vm366_vm4, %v1716_v0 }
  0xdc   : > { %549 = vst.msk [vmem:[#allocation3 + $0x78] sm:$0xff] %vm363_vm3, %v1716_v0 }
  0xdd   : > { %550 = vst.msk [vmem:[#allocation3 + $0x80] sm:$0xff] %vm363_vm3, %v1716_v0 }
  0xde   : > { %551 = vst.msk [vmem:[#allocation3 + $0x88] sm:$0x3] %vm366_vm4, %v1716_v0 }
  0xdf   : > { %552 = vst.msk [vmem:[#allocation3 + $0x90] sm:$0xff] %vm363_vm3, %v1716_v0 }
  0xe0   : > { %553 = vst.msk [vmem:[#allocation3 + $0x98] sm:$0xff] %vm363_vm3, %v1716_v0 }
  0xe1   : > { %554 = vst.msk [vmem:[#allocation3 + $0xa0] sm:$0x3] %vm366_vm4, %v1716_v0 }
  0xe2   : > { %555 = vst.msk [vmem:[#allocation3 + $0xa8] sm:$0xff] %vm363_vm3, %v1716_v0 }
  0xe3   : > { %556 = vst.msk [vmem:[#allocation3 + $0xb0] sm:$0xff] %vm363_vm3, %v1716_v0 }
  0xe4   : > { %557 = vst.msk [vmem:[#allocation3 + $0xb8] sm:$0x3] %vm366_vm4, %v1716_v0 }
  0xe5   : > { %558 = vst.msk [vmem:[#allocation3 + $0xc0] sm:$0xff] %vm363_vm3, %v1716_v0 }
  0xe6   : > { %559 = vst.msk [vmem:[#allocation3 + $0xc8] sm:$0xff] %vm363_vm3, %v1716_v0 }
  0xe7   : > { %560 = vst.msk [vmem:[#allocation3 + $0xd0] sm:$0x3] %vm366_vm4, %v1716_v0 }
  0xe8   : > { %561 = vst.msk [vmem:[#allocation3 + $0xd8] sm:$0xff] %vm363_vm3, %v1716_v0 }
  0xe9   : > { %562 = vst.msk [vmem:[#allocation3 + $0xe0] sm:$0xff] %vm363_vm3, %v1716_v0 }
  0xea   : > { %563 = vst.msk [vmem:[#allocation3 + $0xe8] sm:$0x3] %vm366_vm4, %v1716_v0 }
  0xeb   : > { %564 = vst.msk [vmem:[#allocation3 + $0xf0] sm:$0xff] %vm363_vm3, %v1716_v0 }
  0xec   : > { %565 = vst.msk [vmem:[#allocation3 + $0xf8] sm:$0xff] %vm363_vm3, %v1716_v0 }
  0xed   : > { %566 = vst.msk [vmem:[#allocation3 + $0x100] sm:$0x3] %vm366_vm4, %v1716_v0 }
  0xee   : > { %567 = vst.msk [vmem:[#allocation3 + $0x108] sm:$0xff] %vm363_vm3, %v1716_v0 }
  0xef   : > { %568 = vst.msk [vmem:[#allocation3 + $0x110] sm:$0xff] %vm363_vm3, %v1716_v0 }
  0xf0   : > { %569 = vst.msk [vmem:[#allocation3 + $0x118] sm:$0x3] %vm366_vm4, %v1716_v0 }
  0xf1   : > { %570 = vst.msk [vmem:[#allocation3 + $0x120] sm:$0xff] %vm363_vm3, %v1716_v0 }
  0xf2   : > { %571 = vst.msk [vmem:[#allocation3 + $0x128] sm:$0xff] %vm363_vm3, %v1716_v0 }
  0xf3   : > { %572 = vst.msk [vmem:[#allocation3 + $0x130] sm:$0x3] %vm366_vm4, %v1716_v0 }
  0xf4   : > { %573 = vst.msk [vmem:[#allocation3 + $0x138] sm:$0xff] %vm363_vm3, %v1716_v0 }
  0xf5   : > { %574 = vst.msk [vmem:[#allocation3 + $0x140] sm:$0xff] %vm363_vm3, %v1716_v0 }
  0xf6   : > { %575 = vst.msk [vmem:[#allocation3 + $0x148] sm:$0x3] %vm366_vm4, %v1716_v0 }
  0xf7   : > { %576 = vst.msk [vmem:[#allocation3 + $0x150] sm:$0xff] %vm363_vm3, %v1716_v0 }
  0xf8   : > { %577 = vst.msk [vmem:[#allocation3 + $0x158] sm:$0xff] %vm363_vm3, %v1716_v0 }
  0xf9   : > { %578 = vst.msk [vmem:[#allocation3 + $0x160] sm:$0x3] %vm366_vm4, %v1716_v0 }
  0xfa   : > { %579 = vst.msk [vmem:[#allocation3 + $0x168] sm:$0xff] %vm363_vm3, %v1716_v0 }
  0xfb   : > { %580 = vst.msk [vmem:[#allocation3 + $0x170] sm:$0xff] %vm363_vm3, %v1716_v0 }
  0xfc   : > { %581 = vst.msk [vmem:[#allocation3 + $0x178] sm:$0x3] %vm366_vm4, %v1716_v0 }
  0xfd   : > { %582 = vst.msk [vmem:[#allocation3 + $0x180] sm:$0xff] %vm363_vm3, %v1716_v0 }
  0xfe   : > { %583 = vst.msk [vmem:[#allocation3 + $0x188] sm:$0xff] %vm363_vm3, %v1716_v0 }
  0xff   : > { %584 = vst.msk [vmem:[#allocation3 + $0x190] sm:$0x3] %vm366_vm4, %v1716_v0 }
 0x100   : > { %585 = vst.msk [vmem:[#allocation3 + $0x198] sm:$0xff] %vm363_vm3, %v1716_v0 }
 0x101   : > { %586 = vst.msk [vmem:[#allocation3 + $0x1a0] sm:$0xff] %vm363_vm3, %v1716_v0 }
 0x102   : > { %587 = vst.msk [vmem:[#allocation3 + $0x1a8] sm:$0x3] %vm366_vm4, %v1716_v0 }
 0x103   : > { %588 = vst.msk [vmem:[#allocation3 + $0x1b0] sm:$0xff] %vm363_vm3, %v1716_v0 }
 0x104   : > { %589 = vst.msk [vmem:[#allocation3 + $0x1b8] sm:$0xff] %vm363_vm3, %v1716_v0 }
 0x105   : > { %590 = vst.msk [vmem:[#allocation3 + $0x1c0] sm:$0x3] %vm366_vm4, %v1716_v0 }
 0x106   : > { %591 = vst.msk [vmem:[#allocation3 + $0x1c8] sm:$0xff] %vm363_vm3, %v1716_v0 }
 0x107   : > { %592 = vst.msk [vmem:[#allocation3 + $0x1d0] sm:$0xff] %vm363_vm3, %v1716_v0 }
 0x108   : > { %593 = vst.msk [vmem:[#allocation3 + $0x1d8] sm:$0x3] %vm366_vm4, %v1716_v0 }
 0x109   : > { %594 = vst.msk [vmem:[#allocation3 + $0x1e0] sm:$0xff] %vm363_vm3, %v1716_v0 }
 0x10a   : > { %595 = vst.msk [vmem:[#allocation3 + $0x1e8] sm:$0xff] %vm363_vm3, %v1716_v0 }
 0x10b   : > { %596 = vst.msk [vmem:[#allocation3 + $0x1f0] sm:$0x3] %vm366_vm4, %v1716_v0 }
 0x10c   : > { %597 = vst.msk [vmem:[#allocation3 + $0x1f8] sm:$0xff] %vm363_vm3, %v1716_v0 }
 0x10d   : > { %598 = vst.msk [vmem:[#allocation3 + $0x200] sm:$0xff] %vm363_vm3, %v1716_v0 }
 0x10e   : > { %599 = vst.msk [vmem:[#allocation3 + $0x208] sm:$0x3] %vm366_vm4, %v1716_v0 }
 0x10f   : > { %600 = vst.msk [vmem:[#allocation3 + $0x210] sm:$0xff] %vm363_vm3, %v1716_v0 }
 0x110   : > { %601 = vst.msk [vmem:[#allocation3 + $0x218] sm:$0xff] %vm363_vm3, %v1716_v0 }
 0x111   : > { %602 = vst.msk [vmem:[#allocation3 + $0x220] sm:$0x3] %vm366_vm4, %v1716_v0 }
 0x112   : > { %603 = vst.msk [vmem:[#allocation3 + $0x228] sm:$0xff] %vm363_vm3, %v1716_v0 }
 0x113   : > { %604 = vst.msk [vmem:[#allocation3 + $0x230] sm:$0xff] %vm363_vm3, %v1716_v0 }
 0x114   : > { %605 = vst.msk [vmem:[#allocation3 + $0x238] sm:$0x3] %vm366_vm4, %v1716_v0 }
 0x115   : > { %606 = vst.msk [vmem:[#allocation3 + $0x240] sm:$0xff] %vm363_vm3, %v1716_v0 }
 0x116   : > { %607 = vst.msk [vmem:[#allocation3 + $0x248] sm:$0xff] %vm363_vm3, %v1716_v0 }
 0x117   : > { %608 = vst.msk [vmem:[#allocation3 + $0x250] sm:$0x3] %vm366_vm4, %v1716_v0 }
 0x118   : > { %609 = vst.msk [vmem:[#allocation3 + $0x258] sm:$0xff] %vm363_vm3, %v1716_v0 }
 0x119   : > { %610 = vst.msk [vmem:[#allocation3 + $0x260] sm:$0xff] %vm363_vm3, %v1716_v0 }
 0x11a   : > { %611 = vst.msk [vmem:[#allocation3 + $0x268] sm:$0x3] %vm366_vm4, %v1716_v0 }
 0x11b   : > { %612 = vst.msk [vmem:[#allocation3 + $0x270] sm:$0xff] %vm363_vm3, %v1716_v0 }
 0x11c   : > { %613 = vst.msk [vmem:[#allocation3 + $0x278] sm:$0xff] %vm363_vm3, %v1716_v0 }
 0x11d   : > { %614 = vst.msk [vmem:[#allocation3 + $0x280] sm:$0x3] %vm366_vm4, %v1716_v0 }
 0x11e   : > { %615 = vst.msk [vmem:[#allocation3 + $0x288] sm:$0xff] %vm363_vm3, %v1716_v0 }
 0x11f   : > { %616 = vst.msk [vmem:[#allocation3 + $0x290] sm:$0xff] %vm363_vm3, %v1716_v0 }
 0x120   : > { %617 = vst.msk [vmem:[#allocation3 + $0x298] sm:$0x3] %vm366_vm4, %v1716_v0 }
 0x121   : > { %618 = vst.msk [vmem:[#allocation3 + $0x2a0] sm:$0xff] %vm363_vm3, %v1716_v0 }
 0x122   : > { %619 = vst.msk [vmem:[#allocation3 + $0x2a8] sm:$0xff] %vm363_vm3, %v1716_v0 }
 0x123   : > { %620 = vst.msk [vmem:[#allocation3 + $0x2b0] sm:$0x3] %vm366_vm4, %v1716_v0 }
 0x124   : > { %621 = vst.msk [vmem:[#allocation3 + $0x2b8] sm:$0xff] %vm363_vm3, %v1716_v0 }
 0x125   : > { %622 = vst.msk [vmem:[#allocation3 + $0x2c0] sm:$0xff] %vm363_vm3, %v1716_v0 }
 0x126   : > { %623 = vst.msk [vmem:[#allocation3 + $0x2c8] sm:$0x3] %vm366_vm4, %v1716_v0 }
 0x127   : > { %624 = vst.msk [vmem:[#allocation3 + $0x2d0] sm:$0xff] %vm363_vm3, %v1716_v0 }
 0x128   : > { %625 = vst.msk [vmem:[#allocation3 + $0x2d8] sm:$0xff] %vm363_vm3, %v1716_v0 }
 0x129   : > { %626 = vst.msk [vmem:[#allocation3 + $0x2e0] sm:$0x3] %vm366_vm4, %v1716_v0 }
 0x12a   : > { %627 = vst.msk [vmem:[#allocation3 + $0x2e8] sm:$0xff] %vm363_vm3, %v1716_v0 }
 0x12b   : > { %628 = vst.msk [vmem:[#allocation3 + $0x2f0] sm:$0xff] %vm363_vm3, %v1716_v0 }
 0x12c   : > { %629 = vst.msk [vmem:[#allocation3 + $0x2f8] sm:$0x3] %vm366_vm4, %v1716_v0 }
 0x12d   : > { %662 = vst.msk [vmem:[#allocation2 + $0x31] sm:$0xff] %vm646_vm5, %v660_v9 }
 0x12e   : > { %663 = vst.msk [vmem:[#allocation2 + $0x39] sm:$0xff] %vm646_vm5, %v660_v9 }
 0x12f   : > { %658 = vst.msk [vmem:[#allocation2 + $0x19] sm:$0xff] %vm646_vm5, %v652_v10 }
 0x130   : > { %346 = vst.msk [vmem:[#allocation2] sm:$0x1] %vm345_vm0, %v1716_v0 }
 0x131   : > { %349 = vst.msk [vmem:[#allocation2 + $0x11] sm:$0x1] %vm345_vm0, %v1716_v0 }
 0x132   : > { %350 = vst.msk [vmem:[#allocation2 + $0x29] sm:$0x1] %vm345_vm0, %v1716_v0 }
 0x133   : > { %354 = vst.msk [vmem:[#allocation2 + $0x8] sm:$0xff] %vm352_vm1, %v1716_v0 }
 0x134   : > { %v2400_v12 = vld [vmem:[#allocation2 + $0x30] sm:$0xff]  ;;  %353 = vst.msk [vmem:[#allocation2] sm:$0xff] %vm352_vm1, %v1716_v0 }
 0x135   : > { %v2402_v13 = vld [vmem:[#allocation2 + $0x31] sm:$0xff]  ;;  %v2408_v15 = vld [vmem:[#allocation2 + $0x39] sm:$0xff]  ;;  %364 = vst.msk [vmem:[#allocation2] sm:$0xff] %vm363_vm3, %v1716_v0 }
 0x136   : > { %v2406_v14 = vld [vmem:[#allocation2 + $0x38] sm:$0xff]  ;;  %365 = vst.msk [vmem:[#allocation2 + $0x8] sm:$0xff] %vm363_vm3, %v1716_v0 }
 0x137   : > { %v2410_v16 = vld [vmem:[#allocation2 + $0x32] sm:$0xff]  ;;  %v2414_v17 = vld [vmem:[#allocation2 + $0x3a] sm:$0xff]  ;;  %647 = vst.msk [vmem:[#allocation2 + $0x1] sm:$0xff] %vm646_vm5, %v641_v11 }
 0x138   : > { %v2416_v18 = vld [vmem:[#allocation2 + $0x18] sm:$0xff]  ;;  %356 = vst.msk [vmem:[#allocation2 + $0x10] sm:$0x3] %vm355_vm2, %v1716_v0 }
 0x139   : > { %v2418_v19 = vld [vmem:[#allocation2 + $0x19] sm:$0xff]  ;;  %359 = vst.msk [vmem:[#allocation2 + $0x28] sm:$0x3] %vm355_vm2, %v1716_v0 }
 0x13a   : > { %370 = vst.msk [vmem:[#allocation2 + $0x28] sm:$0x3] %vm366_vm4, %v1716_v0 }
 0x13b   : > { %659 = vst.msk [vmem:[#allocation2 + $0x21] sm:$0xff] %vm646_vm5, %v654_v20 }
 0x13c   : > { %367 = vst.msk [vmem:[#allocation2 + $0x10] sm:$0x3] %vm366_vm4, %v1716_v0 }
 0x13d   : > { %648 = vst.msk [vmem:[#allocation2 + $0x9] sm:$0xff] %vm646_vm5, %v643_v21 }
 0x13e   : > { %v2433_v22 = vld [vmem:[#allocation2] sm:$0xff] }
 0x13f   : > { %v2435_v23 = vld [vmem:[#allocation2 + $0x1] sm:$0xff] }
 0x142   : > { %v2437_v24 = vld [vmem:[#allocation2 + $0x20] sm:$0xff] }
 0x143   : > { %v2439_v25 = vld [vmem:[#allocation2 + $0x21] sm:$0xff] }
 0x144   : > { %v2441_v26 = vld [vmem:[#allocation2 + $0x1a] sm:$0xff]  ;;  %v2443_v27 = vld [vmem:[#allocation2 + $0x22] sm:$0xff]  ;;  %v2451_v31 = vld [vmem:[#allocation2 + $0xa] sm:$0xff] }
 0x145   : > { %v2445_v28 = vld [vmem:[#allocation2 + $0x8] sm:$0xff] }
 0x146   : > { %v2447_v29 = vld [vmem:[#allocation2 + $0x9] sm:$0xff] }
 0x147   : > { %v2449_v30 = vld [vmem:[#allocation2 + $0x2] sm:$0xff] }
 0x148 LB: >> { %s2459_s14 = smul.u32 27, %s1689_s13  ;;  %s1718_s22 = smov 127   ;;  %s1689_s13 = sphi %s2453_s13, %s687_s13  }
 0x149   : >> { %s1719_s0 = smov 126  }
 0x14a   : >> { %s722_s15 = sadd.s32 4, %s2459_s14  ;;  %s707_s16 = sadd.s32 3, %s2459_s14 }
 0x14b   : >> { %s723_s17 = sld [smem:[#allocation5 + %s722_s15]]  ;;  %s737_s19 = sadd.s32 5, %s2459_s14 }
 0x14c   : >> { %s708_s18 = sld [smem:[#allocation5 + %s707_s16]]  ;;  %s752_s21 = sadd.s32 6, %s2459_s14 }
 0x14d   : >> { %s738_s20 = sld [smem:[#allocation5 + %s737_s19]]  ;;  %s767_s24 = sadd.s32 7, %s2459_s14 }
 0x14e   : >> { %s753_s23 = sld [smem:[#allocation5 + %s752_s21]]  ;;  %s782_s25 = sadd.s32 8, %s2459_s14 }
 0x14f   : >> { %s768_s27 = sld [smem:[#allocation5 + %s767_s24]]  ;;  %s818_s29 = sadd.s32 12, %s2459_s14 }
 0x150   : >> { %s783_s28 = sld [smem:[#allocation5 + %s782_s25]]  ;;  %s833_s9 = sadd.s32 13, %s2459_s14 }
 0x151   : >> { %v724_v32 = vstv %s723_s17  ;;  %s819_s8 = sld [smem:[#allocation5 + %s818_s29]]  ;;  %s848_s10 = sadd.s32 14, %s2459_s14 }
 0x152   : >> { %v725_v33 = vmul.f32 %v724_v32, %v2416_v18  ;;  %v709_v34 = vstv %s708_s18  ;;  %v726_v38 = vmul.f32 %v724_v32, %v2437_v24  ;;  %s834_s30 = sld [smem:[#allocation5 + %s833_s9]]  ;;  %s863_s15 = sadd.s32 15, %s2459_s14 }
 0x153   : >> { %v710_v35 = vmul.f32 %v709_v34, %v2433_v22  ;;  %v739_v36 = vstv %s738_s20  ;;  %v711_v39 = vmul.f32 %v709_v34, %v2445_v28  ;;  %s849_s12 = sld [smem:[#allocation5 + %s848_s10]]  ;;  %s878_s17 = sadd.s32 16, %s2459_s14 }
 0x154   : >> { %729 = vrot.lane.b32.xlu1 %v725_v33, %s1718_s22  ;;  %v740_v37 = vmul.f32 %v739_v36, %v2400_v12  ;;  %v754_v40 = vstv %s753_s23  ;;  %v741_v41 = vmul.f32 %v739_v36, %v2406_v14  ;;  %s864_s16 = sld [smem:[#allocation5 + %s863_s15]]  ;;  %s893_s18 = sadd.s32 17, %s2459_s14 }
 0x155   : >> { %714 = vrot.lane.b32.xlu0 %v710_v35, %s1718_s22  ;;  %v756_v42 = vmul.f32 %v754_v40, %v2445_v28  ;;  %v755_v43 = vmul.f32 %v754_v40, %v2433_v22  ;;  %v769_v44 = vstv %s768_s27  ;;  %s879_s19 = sld [smem:[#allocation5 + %s878_s17]]  ;;  %s929_s21 = sadd.s32 21, %s2459_s14 }
 0x156   : >> { %744 = vrot.lane.b32.xlu2 %v740_v37, %s1718_s22  ;;  %v784_v45 = vstv %s783_s28  ;;  %v770_v46 = vmul.f32 %v769_v44, %v2416_v18  ;;  %v771_v48 = vmul.f32 %v769_v44, %v2437_v24  ;;  %s894_s20 = sld [smem:[#allocation5 + %s893_s18]]  ;;  %s944_s24 = sadd.s32 22, %s2459_s14 }
 0x157   : >> { %v785_v47 = vmul.f32 %v784_v45, %v2400_v12  ;;  %v820_v49 = vstv %s819_s8  ;;  %v786_v50 = vmul.f32 %v784_v45, %v2406_v14  ;;  %s930_s23 = sld [smem:[#allocation5 + %s929_s21]]  ;;  %s959_s25 = sadd.s32 23, %s2459_s14 }
 0x158   : >> { %v822_v51 = vmul.f32 %v820_v49, %v2447_v29  ;;  %v821_v52 = vmul.f32 %v820_v49, %v2435_v23  ;;  %v835_v53 = vstv %s834_s30  ;;  %s945_s27 = sld [smem:[#allocation5 + %s944_s24]]  ;;  %s974_s29 = sadd.s32 24, %s2459_s14 }
 0x159   : >> { %v850_v54 = vstv %s849_s12  ;;  %v836_v55 = vmul.f32 %v835_v53, %v2418_v19  ;;  %v837_v57 = vmul.f32 %v835_v53, %v2439_v25  ;;  %s960_s28 = sld [smem:[#allocation5 + %s959_s25]]  ;;  %s989_s9 = sadd.s32 25, %s2459_s14 }
 0x15a   : >> { %v851_v56 = vmul.f32 %v850_v54, %v2402_v13  ;;  %v865_v58 = vstv %s864_s16  ;;  %v852_v59 = vmul.f32 %v850_v54, %v2408_v15  ;;  %s975_s8 = sld [smem:[#allocation5 + %s974_s29]]  ;;  %s1004_s10 = sadd.s32 26, %s2459_s14 }
 0x15b   : >> { %v867_v60 = vmul.f32 %v865_v58, %v2447_v29  ;;  %v866_v61 = vmul.f32 %v865_v58, %v2435_v23  ;;  %v880_v62 = vstv %s879_s19  ;;  %s990_s30 = sld [smem:[#allocation5 + %s989_s9]]  ;;  %s700_s17 = sadd.s32 2, %s2459_s14 }
 0x15c   : >> { %731 = vrot.lane.b32.xlu1 %v726_v38, %s1718_s22  ;;  %v895_v63 = vstv %s894_s20  ;;  %v881_v0 = vmul.f32 %v880_v62, %v2418_v19  ;;  %v882_v2 = vmul.f32 %v880_v62, %v2439_v25  ;;  %s1005_s12 = sld [smem:[#allocation5 + %s1004_s10]]  ;;  %s804_s20 = sadd.s32 10, %s2459_s14 }
 0x15d   : >> { %716 = vrot.lane.b32.xlu0 %v711_v39, %s1718_s22  ;;  %v896_v1 = vmul.f32 %v895_v63, %v2402_v13  ;;  %v931_v5 = vstv %s930_s23  ;;  %v897_v6 = vmul.f32 %v895_v63, %v2408_v15  ;;  %s689_s15 = sld [smem:[#allocation5 + %s2459_s14]]  ;;  %s811_s23 = sadd.s32 11, %s2459_s14 }
 0x15e   : >> { %746 = vrot.lane.b32.xlu2 %v741_v41, %s1718_s22  ;;  %v933_v9 = vmul.f32 %v931_v5, %v2451_v31  ;;  %v932_v10 = vmul.f32 %v931_v5, %v2449_v30  ;;  %v946_v11 = vstv %s945_s27  ;;  %s701_s18 = sld [smem:[#allocation5 + %s700_s17]]  ;;  %s908_s25 = sadd.s32 18, %s2459_s14 }
 0x15f   : >> { %v961_v20 = vstv %s960_s28  ;;  %v947_v21 = vmul.f32 %v946_v11, %v2441_v26  ;;  %v948_v33 = vmul.f32 %v946_v11, %v2443_v27  ;;  %s805_s21 = sld [smem:[#allocation5 + %s804_s20]]  ;;  %s915_s28 = sadd.s32 19, %s2459_s14 }
 0x160   : >> { %v962_v32 = vmul.f32 %v961_v20, %v2410_v16  ;;  %v976_v34 = vstv %s975_s8  ;;  %v963_v35 = vmul.f32 %v961_v20, %v2414_v17  ;;  %s812_s24 = sld [smem:[#allocation5 + %s811_s23]]  ;;  %s922_s8 = sadd.s32 20, %s2459_s14 }
 0x161   : >> { %v978_v36 = vmul.f32 %v976_v34, %v2451_v31  ;;  %v977_v37 = vmul.f32 %v976_v34, %v2449_v30  ;;  %v991_v38 = vstv %s990_s30  ;;  %s909_s27 = sld [smem:[#allocation5 + %s908_s25]]  ;;  %s1720_s10 = smov 1  }
 0x162   : >> { %v1006_v39 = vstv %s1005_s12  ;;  %v992_v40 = vmul.f32 %v991_v38, %v2441_v26  ;;  %s916_s29 = sld [smem:[#allocation5 + %s915_s28]]  ;;  %s1033_s30 = smul.u32 24, %s1689_s13 }
 0x163   : >> { %v1007_v41 = vmul.f32 %v1006_v39, %v2410_v16  ;;  %s923_s9 = sld [smem:[#allocation5 + %s922_s8]] }
 0x164   : >> { %761 = vrot.lane.b32.xlu1 %v756_v42, %s1719_s0  ;;  %v993_v42 = vmul.f32 %v991_v38, %v2443_v27  ;;  %v702_v53 = vstv %s701_s18  ;;  %s1034_s12 = scalar_lea.vmem [#allocation3], %s1033_s30 }
 0x165   : >> { %759 = vrot.lane.b32.xlu0 %v755_v43, %s1719_s0  ;;  %v1008_v43 = vmul.f32 %v1006_v39, %v2414_v17  ;;  %v704_v63 = vmul.f32 %v702_v53, %v2406_v14 }
 0x166   : >> { %774 = vrot.lane.b32.xlu2 %v770_v46, %s1719_s0  ;;  %v690_v46 = vstv %s689_s15 }
 0x16c   : >> { %789 = vrot.lane.b32.xlu1 %v785_v47, %s1719_s0 }
 0x16d   : >> { %776 = vrot.lane.b32.xlu0 %v771_v48, %s1719_s0 }
 0x16e   : >> { %791 = vrot.lane.b32.xlu2 %v786_v50, %s1719_s0 }
 0x174   : >> { %827 = vrot.lane.b32.xlu1 %v822_v51, %s1718_s22  ;;  %v691_v51 = vmul.f32 %v690_v46, %v2433_v22 }
 0x175   : >> { %825 = vrot.lane.b32.xlu0 %v821_v52, %s1718_s22 }
 0x176   : >> { %840 = vrot.lane.b32.xlu2 %v836_v55, %s1718_s22  ;;  %v703_v55 = vmul.f32 %v702_v53, %v2400_v12 }
 0x17c   : >> { %855 = vrot.lane.b32.xlu1 %v851_v56, %s1718_s22  ;;  %v692_v56 = vmul.f32 %v690_v46, %v2445_v28 }
 0x17d   : >> { %842 = vrot.lane.b32.xlu0 %v837_v57, %s1718_s22 }
 0x17e   : >> { %857 = vrot.lane.b32.xlu2 %v852_v59, %s1718_s22 }
 0x184   : >> { %872 = vrot.lane.b32.xlu1 %v867_v60, %s1719_s0 }
 0x185   : >> { %870 = vrot.lane.b32.xlu0 %v866_v61, %s1719_s0 }
 0x186   : >> { %885 = vrot.lane.b32.xlu2 %v881_v0, %s1719_s0 }
 0x18c   : >> { %900 = vrot.lane.b32.xlu1 %v896_v1, %s1719_s0 }
 0x18d   : >> { %887 = vrot.lane.b32.xlu0 %v882_v2, %s1719_s0 }
 0x18e   : >> { %902 = vrot.lane.b32.xlu2 %v897_v6, %s1719_s0 }
 0x194   : >> { %938 = vrot.lane.b32.xlu1 %v933_v9, %s1718_s22 }
 0x195   : >> { %936 = vrot.lane.b32.xlu0 %v932_v10, %s1718_s22 }
 0x196   : >> { %951 = vrot.lane.b32.xlu2 %v947_v21, %s1718_s22 }
 0x19c   : >> { %966 = vrot.lane.b32.xlu1 %v962_v32, %s1718_s22 }
 0x19d   : >> { %953 = vrot.lane.b32.xlu0 %v948_v33, %s1718_s22 }
 0x19e   : >> { %968 = vrot.lane.b32.xlu2 %v963_v35, %s1718_s22  ;;  %s693_s22 = sadd.s32 1, %s2459_s14 }
 0x19f   : >> { %s694_s16 = sld [smem:[#allocation5 + %s693_s22]] }
 0x1a4   : >> { %983 = vrot.lane.b32.xlu1 %v978_v36, %s1719_s0 }
 0x1a5   : >> { %981 = vrot.lane.b32.xlu0 %v977_v37, %s1719_s0  ;;  %v695_v47 = vstv %s694_s16 }
 0x1a6   : >> { %996 = vrot.lane.b32.xlu2 %v992_v40, %s1719_s0  ;;  %v696_v52 = vmul.f32 %v695_v47, %v2416_v18  ;;  %v697_v57 = vmul.f32 %v695_v47, %v2437_v24 }
 0x1a8   : >> { %v698_v54 = vadd.f32 %v696_v52, %v691_v51  ;;  %v699_v62 = vadd.f32 %v697_v57, %v692_v56 }
 0x1aa   : >> { %v705_v59 = vadd.f32 %v703_v55, %v698_v54  ;;  %v706_v1 = vadd.f32 %v704_v63, %v699_v62 }
 0x1ac   : >> { %1011 = vrot.lane.b32.xlu1 %v1007_v41, %s1719_s0 }
 0x1ad   : >> { %998 = vrot.lane.b32.xlu0 %v993_v42, %s1719_s0  ;;  %v806_v42 = vstv %s805_s21 }
 0x1ae   : >> { %1013 = vrot.lane.b32.xlu2 %v1008_v43, %s1719_s0  ;;  %s797_s0 = sadd.s32 9, %s2459_s14  ;;  %v808_v53 = vmul.f32 %v806_v42, %v2439_v25  ;;  %s1019_s14 = sld [smem:[#allocation7 + %s1689_s13]] }
 0x1af   : >> { %s798_s19 = sld [smem:[#allocation5 + %s797_s0]]  ;;  %s687_s13 = sadd.s32 1, %s1689_s13  }
 0x1b0   : >> { %v745_v44 = vpop.permute.xlu2 %744  ;;  %p684_p7 = scmp.ge.s32.totalorder %s687_s13, 32  }
 0x1b1   : > { %s2593_s22 = smov (%p684_p7), 0  }
 0x1b5   : >> { %v799_v35 = vstv %s798_s19 }
 0x1b6   : >> { %v800_v38 = vmul.f32 %v799_v35, %v2435_v23 }
 0x1b8   : >> { %v747_v45 = vpop.permute.xlu2 %746 }
 0x1c0   : >> { %v775_v48 = vpop.permute.xlu2 %774 }
 0x1c6   : >> { %v730_v49 = vpop.permute.xlu1 %729 }
 0x1c7   : >> { %v715_v50 = vpop.permute.xlu0 %714 }
 0x1c8   : >> { %v792_v61 = vpop.permute.xlu2 %791  ;;  %v720_v0 = vadd.f32 %v715_v50, %v705_v59 }
 0x1ca   : >> { %v735_v5 = vadd.f32 %v730_v49, %v720_v0  ;;  %v801_v49 = vmul.f32 %v799_v35, %v2447_v29 }
 0x1cc   : >> { %v750_v11 = vadd.f32 %v745_v44, %v735_v5  ;;  %v807_v44 = vmul.f32 %v806_v42, %v2418_v19 }
 0x1ce   : >> { %v732_v58 = vpop.permute.xlu1 %731 }
 0x1cf   : >> { %v717_v60 = vpop.permute.xlu0 %716 }
 0x1d0   : >> { %v721_v9 = vadd.f32 %v717_v60, %v706_v1  ;;  %v841_v10 = vpop.permute.xlu2 %840 }
 0x1d2   : >> { %v736_v20 = vadd.f32 %v732_v58, %v721_v9 }
 0x1d4   : >> { %v751_v34 = vadd.f32 %v747_v45, %v736_v20  ;;  %v813_v45 = vstv %s812_s24  ;;  %v910_v20 = vstv %s909_s27 }
 0x1d5   : >> { %v814_v51 = vmul.f32 %v813_v45, %v2402_v13  ;;  %v815_v58 = vmul.f32 %v813_v45, %v2408_v15  ;;  %v911_v35 = vmul.f32 %v910_v20, %v2449_v30  ;;  %v912_v42 = vmul.f32 %v910_v20, %v2451_v31 }
 0x1d6   : >> { %v762_v2 = vpop.permute.xlu1 %761 }
 0x1d7   : >> { %v760_v6 = vpop.permute.xlu0 %759  ;;  %v766_v37 = vadd.f32 %v762_v2, %v751_v34 }
 0x1d8   : >> { %v765_v21 = vadd.f32 %v760_v6, %v750_v11  ;;  %v858_v40 = vpop.permute.xlu2 %857 }
 0x1da   : >> { %v780_v36 = vadd.f32 %v775_v48, %v765_v21 }
 0x1de   : >> { %v790_v32 = vpop.permute.xlu1 %789 }
 0x1df   : >> { %v777_v33 = vpop.permute.xlu0 %776  ;;  %v795_v39 = vadd.f32 %v790_v32, %v780_v36 }
 0x1e0   : >> { %v781_v41 = vadd.f32 %v777_v33, %v766_v37  ;;  %v886_v54 = vpop.permute.xlu2 %885 }
 0x1e1   : >> { %v802_v46 = vadd.f32 %v800_v38, %v795_v39  ;;  %v917_v38 = vstv %s916_s29 }
 0x1e2   : >> { %v796_v50 = vadd.f32 %v792_v61, %v781_v41  ;;  %v918_v41 = vmul.f32 %v917_v38, %v2441_v26  ;;  %v919_v45 = vmul.f32 %v917_v38, %v2443_v27 }
 0x1e3   : >> { %v809_v48 = vadd.f32 %v807_v44, %v802_v46  ;;  %v924_v46 = vstv %s923_s9 }
 0x1e4   : >> { %v803_v52 = vadd.f32 %v801_v49, %v796_v50 }
 0x1e5   : >> { %v816_v56 = vadd.f32 %v814_v51, %v809_v48 }
 0x1e6   : >> { %v828_v43 = vpop.permute.xlu1 %827  ;;  %v810_v59 = vadd.f32 %v808_v53, %v803_v52  ;;  %v926_v52 = vmul.f32 %v924_v46, %v2414_v17 }
 0x1e7   : >> { %v826_v47 = vpop.permute.xlu0 %825 }
 0x1e8   : >> { %v831_v60 = vadd.f32 %v826_v47, %v816_v56  ;;  %v817_v62 = vadd.f32 %v815_v58, %v810_v59  ;;  %v903_v1 = vpop.permute.xlu2 %902  ;;  %v925_v47 = vmul.f32 %v924_v46, %v2410_v16  ;;  %v2591_v46 = vmov (%p684_p7), 0.0  }
 0x1ea   : >> { %v846_v63 = vadd.f32 %v841_v10, %v831_v60  ;;  %v832_v2 = vadd.f32 %v828_v43, %v817_v62 }
 0x1ee   : >> { %v856_v55 = vpop.permute.xlu1 %855 }
 0x1ef   : >> { %v843_v57 = vpop.permute.xlu0 %842  ;;  %v861_v5 = vadd.f32 %v856_v55, %v846_v63 }
 0x1f0   : >> { %v847_v6 = vadd.f32 %v843_v57, %v832_v2  ;;  %v952_v10 = vpop.permute.xlu2 %951 }
 0x1f2   : >> { %v862_v11 = vadd.f32 %v858_v40, %v847_v6 }
 0x1f6   : >> { %v873_v61 = vpop.permute.xlu1 %872 }
 0x1f7   : >> { %v871_v0 = vpop.permute.xlu0 %870  ;;  %v877_v34 = vadd.f32 %v873_v61, %v862_v11 }
 0x1f8   : >> { %v876_v9 = vadd.f32 %v871_v0, %v861_v5  ;;  %v969_v51 = vpop.permute.xlu2 %968 }
 0x1fa   : >> { %v891_v32 = vadd.f32 %v886_v54, %v876_v9  ;;  %v1020_v9 = vstv %s1019_s14 }
 0x1fe   : >> { %v901_v21 = vpop.permute.xlu1 %900 }
 0x1ff   : >> { %v888_v33 = vpop.permute.xlu0 %887  ;;  %v906_v36 = vadd.f32 %v901_v21, %v891_v32 }
 0x200   : >> { %v892_v37 = vadd.f32 %v888_v33, %v877_v34  ;;  %v997_v59 = vpop.permute.xlu2 %996 }
 0x201   : >> { %v913_v39 = vadd.f32 %v911_v35, %v906_v36 }
 0x202   : >> { %v907_v43 = vadd.f32 %v903_v1, %v892_v37 }
 0x203   : >> { %v920_v49 = vadd.f32 %v918_v41, %v913_v39  ;;  %v2585_v41 = vmov (%p684_p7), 0.0  }
 0x204   : >> { %v914_v50 = vadd.f32 %v912_v42, %v907_v43  ;;  %v2587_v42 = vmov (%p684_p7), 0.0   ;;  %v2589_v43 = vmov (%p684_p7), 0.0  }
 0x205   : >> { %v927_v48 = vadd.f32 %v925_v47, %v920_v49 }
 0x206   : >> { %v939_v40 = vpop.permute.xlu1 %938  ;;  %v921_v53 = vadd.f32 %v919_v45, %v914_v50 }
 0x207   : >> { %v937_v44 = vpop.permute.xlu0 %936 }
 0x208   : >> { %v942_v56 = vadd.f32 %v937_v44, %v927_v48  ;;  %v928_v57 = vadd.f32 %v926_v52, %v921_v53  ;;  %v1014_v32 = vpop.permute.xlu2 %1013 }
 0x20a   : >> { %v957_v58 = vadd.f32 %v952_v10, %v942_v56  ;;  %v943_v60 = vadd.f32 %v939_v40, %v928_v57 }
 0x20e   : >> { %v967_v54 = vpop.permute.xlu1 %966 }
 0x20f   : >> { %v954_v55 = vpop.permute.xlu0 %953  ;;  %v972_v61 = vadd.f32 %v967_v54, %v957_v58 }
 0x210   : >> { %v958_v0 = vadd.f32 %v954_v55, %v943_v60 }
 0x212   : >> { %v973_v2 = vadd.f32 %v969_v51, %v958_v0 }
 0x216   : >> { %v984_v62 = vpop.permute.xlu1 %983 }
 0x217   : >> { %v982_v63 = vpop.permute.xlu0 %981  ;;  %v988_v6 = vadd.f32 %v984_v62, %v973_v2 }
 0x218   : >> { %v987_v1 = vadd.f32 %v982_v63, %v972_v61 }
 0x21a   : >> { %v1002_v5 = vadd.f32 %v997_v59, %v987_v1 }
 0x21e   : >> { %v1012_v11 = vpop.permute.xlu1 %1011 }
 0x21f   : >> { %v1017_v20 = vadd.f32 %v1012_v11, %v1002_v5  ;;  %v999_v21 = vpop.permute.xlu0 %998 }
 0x220   : >> { %v1003_v33 = vadd.f32 %v999_v21, %v988_v6 }
 0x221   : >> { %v1021_v34 = vadd.f32 %v1020_v9, %v1017_v20 }
 0x222   : >> { %v1018_v35 = vadd.f32 %v1014_v32, %v1003_v33 }
 0x223   : >> { %v1023_v36 = vmax.f32 %v1021_v34, 0.0 }
 0x224   : >> { %v1022_v10 = vadd.f32 %v1020_v9, %v1018_v35 }
 0x225   : >> { %1027 = vrot.lane.b32.xlu0 %v1023_v36, %s1720_s10 }
 0x226   : >> { %v1024_v37 = vmax.f32 %v1022_v10, 0.0 }
 0x228   : >> { %1029 = vrot.lane.b32.xlu1 %v1024_v37, %s1720_s10 }
 0x297   : >> { %v1028_v38 = vpop.permute.xlu0 %1027  ;;  %686 = sbr.rel (!%p684_p7) target bundleno = 328 (0x148), region = 117 }
 0x298   : >> { %1035 = vst.msk [vmem:[%s1034_s12 + $0x1] sm:$0xff] %vm646_vm5, %v1028_v38 }
 0x29a   : >> { %v1030_v39 = vpop.permute.xlu1 %1029 }
 0x29b   : >> { %1036 = vst.msk [vmem:[%s1034_s12 + $0x9] sm:$0xff] %vm646_vm5, %v1030_v39 }
 0x29c LB: >> { %s2611_s13 = smul.u32 9, %s1709_s22  ;;  %s1721_s21 = smov 127   ;;  %s1709_s22 = sphi %s2593_s22, %s1042_s22   ;;  %v1705_v46 = vphi %v2591_v46, %v2755_v46   ;;  %v1701_v43 = vphi %v2589_v43, %v2754_v43   ;;  %v1697_v42 = vphi %v2587_v42, %v2753_v42   ;;  %v1693_v41 = vphi %v2585_v41, %v2752_v41  }
 0x29d   : >> { %s1048_s15 = smul.u32 24, %s1709_s22  ;;  %s1722_s24 = smov 126  }
 0x29e   : >> { %s1064_s16 = sadd.s32 1, %s2611_s13  ;;  %s1093_s17 = sadd.s32 2, %s2611_s13 }
 0x29f   : >> { %s1079_s18 = sld [smem:[#allocation10 + %s1064_s16]]  ;;  %s2616_s20 = scalar_lea.vmem [#allocation3], %s1048_s15 }
 0x2a0   : >> { %s1065_s0 = sld [smem:[#allocation9 + %s1064_s16]]  ;;  %s1137_s25 = sadd.s32 4, %s2611_s13 }
 0x2a1   : >> { %s1094_s19 = sld [smem:[#allocation9 + %s1093_s17]]  ;;  %s1166_s29 = sadd.s32 5, %s2611_s13 }
 0x2a2   : >> { %v2619_v12 = vld [vmem:[%s2616_s20] sm:$0xff]  ;;  %v2626_v19 = vld [vmem:[%s2616_s20 + $0x8] sm:$0xff]  ;;  %s1108_s23 = sld [smem:[#allocation10 + %s1093_s17]]  ;;  %s1210_s14 = sadd.s32 7, %s2611_s13 }
 0x2a3   : >> { %s1138_s27 = sld [smem:[#allocation9 + %s1137_s25]]  ;;  %v2640_v28 = vld [vmem:[%s2616_s20 + $0x1] sm:$0xff]  ;;  %v2647_v40 = vld [vmem:[%s2616_s20 + $0x9] sm:$0xff]  ;;  %s1239_s12 = sadd.s32 8, %s2611_s13 }
 0x2a4   : >> { %s1152_s28 = sld [smem:[#allocation10 + %s1137_s25]]  ;;  %v2663_v53 = vld [vmem:[%s2616_s20 + $0x2] sm:$0xff]  ;;  %v2670_v57 = vld [vmem:[%s2616_s20 + $0xa] sm:$0xff]  ;;  %s1042_s22 = sadd.s32 1, %s1709_s22  }
 0x2a5   : >> { %v1080_v13 = vstv %s1079_s18  ;;  %s1167_s8 = sld [smem:[#allocation9 + %s1166_s29]]  ;;  %s1124_s18 = sadd.s32 3, %s2611_s13 }
 0x2a6   : >> { %v1081_v14 = vmul.f32 %v1080_v13, %v2619_v12  ;;  %v1066_v15 = vstv %s1065_s0  ;;  %v1082_v22 = vmul.f32 %v1080_v13, %v2626_v19  ;;  %s1181_s9 = sld [smem:[#allocation10 + %s1166_s29]]  ;;  %p1039_p8 = scmp.ge.s32.totalorder %s1042_s22, 32  }
 0x2a7   : >> { %v1067_v16 = vmul.f32 %v1066_v15, %v2619_v12  ;;  %v1095_v17 = vstv %s1094_s19  ;;  %v1068_v23 = vmul.f32 %v1066_v15, %v2626_v19  ;;  %s1211_s10 = sld [smem:[#allocation9 + %s1210_s14]]  ;;  %s1723_s25 = smov (%p1039_p8), 16   ;;  %vm1284_vm6 = vcmask (%p1039_p8), 130048  }
 0x2a8   : >> { %1085 = vrot.lane.b32.xlu1 %v1081_v14, %s1721_s21  ;;  %v1096_v18 = vmul.f32 %v1095_v17, %v2619_v12  ;;  %v1097_v24 = vmul.f32 %v1095_v17, %v2626_v19  ;;  %v1109_v25 = vstv %s1108_s23  ;;  %s1225_s30 = sld [smem:[#allocation10 + %s1210_s14]]  ;;  %vm1295_vm7 = vcmask (%p1039_p8), 261248  }
 0x2a9   : >> { %1071 = vrot.lane.b32.xlu0 %v1067_v16, %s1721_s21  ;;  %v1111_v26 = vmul.f32 %v1109_v25, %v2626_v19  ;;  %v1110_v27 = vmul.f32 %v1109_v25, %v2619_v12  ;;  %v1139_v29 = vstv %s1138_s27  ;;  %s1240_s15 = sld [smem:[#allocation9 + %s1239_s12]] }
 0x2aa   : >> { %1100 = vrot.lane.b32.xlu2 %v1096_v18, %s1722_s24  ;;  %v1140_v30 = vmul.f32 %v1139_v29, %v2640_v28  ;;  %v1153_v31 = vstv %s1152_s28  ;;  %v1141_v47 = vmul.f32 %v1139_v29, %v2647_v40  ;;  %s1254_s16 = sld [smem:[#allocation10 + %s1239_s12]] }
 0x2ab   : >> { %v1154_v44 = vmul.f32 %v1153_v31, %v2640_v28  ;;  %v1155_v49 = vmul.f32 %v1153_v31, %v2647_v40  ;;  %v1168_v50 = vstv %s1167_s8  ;;  %s1052_s17 = sld [smem:[#allocation9 + %s2611_s13]] }
 0x2ac   : >> { %v1170_v45 = vmul.f32 %v1168_v50, %v2647_v40  ;;  %v1169_v51 = vmul.f32 %v1168_v50, %v2640_v28  ;;  %v1182_v48 = vstv %s1181_s9  ;;  %s1058_s0 = sld [smem:[#allocation10 + %s2611_s13]] }
 0x2ad   : >> { %v1183_v52 = vmul.f32 %v1182_v48, %v2640_v28  ;;  %v1212_v54 = vstv %s1211_s10  ;;  %v1184_v56 = vmul.f32 %v1182_v48, %v2647_v40  ;;  %s2692_s19 = sld [smem:[#allocation9 + %s1124_s18]] }
 0x2ae   : >> { %v1213_v55 = vmul.f32 %v1212_v54, %v2663_v53  ;;  %v1214_v58 = vmul.f32 %v1212_v54, %v2670_v57  ;;  %v1226_v59 = vstv %s1225_s30  ;;  %s2696_s20 = sld [smem:[#allocation10 + %s1124_s18]] }
 0x2af   : >> { %v1228_v60 = vmul.f32 %v1226_v59, %v2670_v57  ;;  %v1227_v62 = vmul.f32 %v1226_v59, %v2663_v53  ;;  %v1241_v61 = vstv %s1240_s15  ;;  %s1268_s27 = sld [smem:[#allocation12]] (%p1039_p8) }
 0x2b0   : >> { %1087 = vrot.lane.b32.xlu1 %v1082_v22, %s1721_s21  ;;  %v1242_v63 = vmul.f32 %v1241_v61, %v2663_v53  ;;  %v1255_v0 = vstv %s1254_s16  ;;  %v1243_v2 = vmul.f32 %v1241_v61, %v2670_v57 }
 0x2b1   : >> { %1073 = vrot.lane.b32.xlu0 %v1068_v23, %s1721_s21  ;;  %v1256_v1 = vmul.f32 %v1255_v0, %v2663_v53  ;;  %v1257_v5 = vmul.f32 %v1255_v0, %v2670_v57  ;;  %v1053_v35 = vstv %s1052_s17 }
 0x2b2   : >> { %1102 = vrot.lane.b32.xlu2 %v1097_v24, %s1722_s24  ;;  %v1054_v36 = vmul.f32 %v1053_v35, %v2619_v12  ;;  %v1059_v14 = vstv %s1058_s0  ;;  %v1055_v24 = vmul.f32 %v1053_v35, %v2626_v19 }
 0x2b3   : >> { %v1126_v15 = vstv %s2692_s19  ;;  %v1061_v16 = vmul.f32 %v1059_v14, %v2626_v19 }
 0x2b4   : >> { %v1056_v37 = vadd.f32 %v1705_v46, %v1054_v36  ;;  %v1127_v22 = vmul.f32 %v1126_v15, %v2640_v28  ;;  %v1132_v29 = vstv %s2696_s20  ;;  %v1057_v31 = vadd.f32 %v1701_v43, %v1055_v24 }
 0x2b5   : >> { %v1063_v46 = vadd.f32 %v1693_v41, %v1061_v16  ;;  %v1128_v59 = vmul.f32 %v1126_v15, %v2647_v40 }
 0x2b8   : >> { %1116 = vrot.lane.b32.xlu1 %v1111_v26, %s1722_s24  ;;  %v1060_v26 = vmul.f32 %v1059_v14, %v2619_v12 }
 0x2b9   : >> { %1114 = vrot.lane.b32.xlu0 %v1110_v27, %s1722_s24 }
 0x2ba   : >> { %1144 = vrot.lane.b32.xlu2 %v1140_v30, %s1721_s21 }
 0x2c0   : >> { %1158 = vrot.lane.b32.xlu1 %v1154_v44, %s1721_s21 }
 0x2c1   : >> { %1146 = vrot.lane.b32.xlu0 %v1141_v47, %s1721_s21 }
 0x2c2   : >> { %1160 = vrot.lane.b32.xlu2 %v1155_v49, %s1721_s21  ;;  %v1062_v49 = vadd.f32 %v1697_v42, %v1060_v26  ;;  %v1269_v26 = vstv (%p1039_p8), %s1268_s27 }
 0x2c8   : >> { %1175 = vrot.lane.b32.xlu1 %v1170_v45, %s1722_s24 }
 0x2c9   : >> { %1173 = vrot.lane.b32.xlu0 %v1169_v51, %s1722_s24  ;;  %v1134_v51 = vmul.f32 %v1132_v29, %v2647_v40 }
 0x2ca   : >> { %1187 = vrot.lane.b32.xlu2 %v1183_v52, %s1722_s24 }
 0x2d0   : >> { %1217 = vrot.lane.b32.xlu1 %v1213_v55, %s1721_s21 }
 0x2d1   : >> { %1189 = vrot.lane.b32.xlu0 %v1184_v56, %s1722_s24  ;;  %v1133_v56 = vmul.f32 %v1132_v29, %v2640_v28 }
 0x2d2   : >> { %1219 = vrot.lane.b32.xlu2 %v1214_v58, %s1721_s21 }
 0x2d8   : >> { %1233 = vrot.lane.b32.xlu1 %v1228_v60, %s1721_s21 }
 0x2d9   : >> { %1231 = vrot.lane.b32.xlu0 %v1227_v62, %s1721_s21  ;;  %s1197_s21 = sadd.s32 6, %s2611_s13 }
 0x2da   : >> { %1246 = vrot.lane.b32.xlu2 %v1242_v63, %s1722_s24  ;;  %s2700_s23 = sld [smem:[#allocation9 + %s1197_s21]] }
 0x2db   : >> { %s2711_s13 = sld [smem:[#allocation10 + %s1197_s21]] }
 0x2e0   : >> { %1260 = vrot.lane.b32.xlu1 %v1256_v1, %s1722_s24  ;;  %v1199_v47 = vstv %s2700_s23 }
 0x2e1   : >> { %1248 = vrot.lane.b32.xlu0 %v1243_v2, %s1722_s24  ;;  %v1200_v12 = vmul.f32 %v1199_v47, %v2663_v53  ;;  %v1205_v0 = vstv %s2711_s13  ;;  %v1201_v28 = vmul.f32 %v1199_v47, %v2670_v57 }
 0x2e2   : >> { %1262 = vrot.lane.b32.xlu2 %v1257_v5, %s1722_s24  ;;  %s1448_s24 = sld [smem:[#allocation12 + $0x1]] (%p1039_p8) }
 0x304   : >> { %v1101_v6 = vpop.permute.xlu2 %1100 }
 0x30c   : >> { %v1103_v9 = vpop.permute.xlu2 %1102 }
 0x314   : >> { %v1145_v20 = vpop.permute.xlu2 %1144 }
 0x31a   : >> { %v1086_v11 = vpop.permute.xlu1 %1085 }
 0x31b   : >> { %v1072_v21 = vpop.permute.xlu0 %1071  ;;  %v1091_v52 = vadd.f32 %v1086_v11, %v1062_v49 }
 0x31c   : >> { %v1161_v33 = vpop.permute.xlu2 %1160  ;;  %v1077_v13 = vadd.f32 %v1072_v21, %v1056_v37 }
 0x31e   : >> { %v1106_v18 = vadd.f32 %v1101_v6, %v1077_v13  ;;  %v1207_v6 = vmul.f32 %v1205_v0, %v2670_v57 }
 0x320   : >> { %v1129_v27 = vadd.f32 %v1127_v22, %v1106_v18 }
 0x322   : >> { %v1088_v32 = vpop.permute.xlu1 %1087  ;;  %v1150_v50 = vadd.f32 %v1145_v20, %v1129_v27 }
 0x323   : >> { %v1074_v34 = vpop.permute.xlu0 %1073  ;;  %v1092_v30 = vadd.f32 %v1088_v32, %v1063_v46 }
 0x324   : >> { %v1188_v39 = vpop.permute.xlu2 %1187  ;;  %v1078_v19 = vadd.f32 %v1074_v34, %v1057_v31 }
 0x326   : >> { %v1107_v42 = vadd.f32 %v1103_v9, %v1078_v19 }
 0x328   : >> { %v1130_v11 = vadd.f32 %v1128_v59, %v1107_v42 }
 0x32a   : >> { %v1117_v10 = vpop.permute.xlu1 %1116 }
 0x32b   : >> { %v1115_v38 = vpop.permute.xlu0 %1114  ;;  %v1121_v45 = vadd.f32 %v1117_v10, %v1092_v30 }
 0x32c   : >> { %v1220_v25 = vpop.permute.xlu2 %1219  ;;  %v1120_v43 = vadd.f32 %v1115_v38, %v1091_v52 }
 0x32d   : >> { %v1136_v54 = vadd.f32 %v1134_v51, %v1121_v45 }
 0x32e   : >> { %v1135_v1 = vadd.f32 %v1133_v56, %v1120_v43 }
 0x32f   : >> { %v1165_v62 = vadd.f32 %v1161_v33, %v1136_v54  ;;  %v1206_v33 = vmul.f32 %v1205_v0, %v2663_v53  ;;  %v1277_v53 = vstv (%p1039_p8), %s1448_s24 }
 0x332   : >> { %v1159_v17 = vpop.permute.xlu1 %1158 }
 0x333   : >> { %v1147_v23 = vpop.permute.xlu0 %1146  ;;  %v1164_v20 = vadd.f32 %v1159_v17, %v1135_v1 }
 0x334   : >> { %v1247_v55 = vpop.permute.xlu2 %1246  ;;  %v1151_v21 = vadd.f32 %v1147_v23, %v1130_v11 }
 0x335   : >> { %v1193_v40 = vadd.f32 %v1188_v39, %v1164_v20 }
 0x337   : >> { %v1208_v13 = vadd.f32 %v1206_v33, %v1193_v40 }
 0x33a   : >> { %v1176_v44 = vpop.permute.xlu1 %1175 }
 0x33b   : >> { %v1174_v48 = vpop.permute.xlu0 %1173  ;;  %v1180_v34 = vadd.f32 %v1176_v44, %v1151_v21 }
 0x33c   : >> { %v1179_v41 = vadd.f32 %v1174_v48, %v1150_v50  ;;  %v1263_v35 = vpop.permute.xlu2 %1262 }
 0x33d   : >> { %v1203_v38 = vadd.f32 %v1201_v28, %v1180_v34 }
 0x33e   : >> { %v1202_v58 = vadd.f32 %v1200_v12, %v1179_v41 }
 0x33f   : >> { %v1224_v15 = vadd.f32 %v1220_v25, %v1203_v38 }
 0x342   : >> { %v1218_v60 = vpop.permute.xlu1 %1217 }
 0x343   : >> { %v1223_v61 = vadd.f32 %v1218_v60, %v1202_v58  ;;  %v1190_v63 = vpop.permute.xlu0 %1189 }
 0x344   : >> { %v1194_v2 = vadd.f32 %v1190_v63, %v1165_v62 }
 0x345   : >> { %v1252_v5 = vadd.f32 %v1247_v55, %v1223_v61  }
 0x346   : >> { %v1209_v32 = vadd.f32 %v1207_v6, %v1194_v2 }
 0x347   : >> { %v2755_v46 = vmov %v1252_v5  ;;  %v1270_v27 = vadd.f32 (%p1039_p8), %v1269_v26, %v1252_v5 }
 0x349   : > { %v1272_v29 = vadd.f32 (%p1039_p8), %v1270_v27, %v1853_v4 }
 0x34a   : >> { %v1234_v9 = vpop.permute.xlu1 %1233 }
 0x34b   : >> { %v1238_v36 = vadd.f32 %v1234_v9, %v1209_v32  ;;  %v1232_v10 = vpop.permute.xlu0 %1231  ;;  %v1274_v30 = vmul.f32 (%p1039_p8), 0.0001, %v1272_v29 }
 0x34c   : >> { %v1237_v14 = vadd.f32 %v1232_v10, %v1208_v13 }
 0x34d   : >> { %v1267_v37 = vadd.f32 %v1263_v35, %v1238_v36   ;;  %1285 = vst.msk [vmem:[%s1845_s11] sm:$0xff] (%p1039_p8), %vm1284_vm6, %v1274_v30 }
 0x34f   : >> { %v2752_v41 = vmov %v1267_v37  ;;  %v1279_v39 = vadd.f32 (%p1039_p8), %v1277_v53, %v1267_v37 }
 0x351   : > { %v1281_v24 = vadd.f32 (%p1039_p8), %v1279_v39, %v1869_v7 }
 0x352   : >> { %v1261_v16 = vpop.permute.xlu1 %1260  ;;  %1041 = sbr.rel (!%p1039_p8) target bundleno = 668 (0x29c), region = 128 }
 0x353   : >> { %v1266_v18 = vadd.f32 %v1261_v16, %v1237_v14   ;;  %v1249_v17 = vpop.permute.xlu0 %1248  ;;  %v1283_v25 = vmul.f32 (%p1039_p8), 0.0001, %v1281_v24 }
 0x354   : >> { %v1253_v22 = vadd.f32 %v1249_v17, %v1224_v15  }
 0x355   : >> { %v2753_v42 = vmov %v1266_v18  ;;  %v1278_v57 = vadd.f32 (%p1039_p8), %v1277_v53, %v1266_v18 }
 0x356   : >> { %v2754_v43 = vmov %v1253_v22  ;;  %v1271_v31 = vadd.f32 (%p1039_p8), %v1269_v26, %v1253_v22 }
 0x357   : > { %v1280_v23 = vadd.f32 %v1278_v57, %v1851_v3 }
 0x358   : > { %v1273_v3 = vadd.f32 %v1271_v31, %v1871_v8 }
 0x359   : > { %v1282_v46 = vmul.f32 0.0001, %v1280_v23 }
 0x35a   : > { %v1275_v44 = vmul.f32 0.0001, %v1273_v3 }
 0x35b   : > { %1289 = vrot.lane.b32.xlu0 %v1282_v46, %s1723_s25 }
 0x35c   : > { %1286 = vst.msk [vmem:[%s1845_s11 + $0x8] sm:$0xff] %vm1284_vm6, %v1275_v44 }
 0x363   : > { %1291 = vrot.lane.b32.xlu0 %v1283_v25, %s1723_s25 }
 0x3cd   : > { %v1290_v47 = vpop.permute.xlu0 %1289 }
 0x3ce   : > { %1296 = vst.msk [vmem:[%s1845_s11] sm:$0xff] %vm1295_vm7, %v1290_v47 }
 0x3d5   : > { %v1292_v7 = vpop.permute.xlu0 %1291 }
 0x3d6   : > { %1297 = vst.msk [vmem:[%s1845_s11 + $0x8] sm:$0xff] %vm1295_vm7, %v1292_v7 }
 0x3d7 PF: > { %s21_s26 = sadd.s32 1, %s1685_s26  }
 0x3d8   : > { %p18_p9 = scmp.ge.s32.totalorder %s21_s26, 4  }
 0x3da   :  { %20 = sbr.rel (!%p18_p9) target bundleno = 5 (0x5), region = 139 }
 0x3df   :  { %1319 = vsyncpa [#allocation6], 1 }
 0x3e0   :  { %1321 = vsyncpa [#allocation6 + $0x1], 1 }
 0x3e1   :  { %1322 = vsyncpa [#allocation8], 1 }
 0x3e2   :  { %1323 = vsyncpa [#allocation11], 1 }

</bundles_post_ra>
